<compile_context>
chip_gen: v7x
topology: tpu7x:2x2x1
jax: 0.10.0
libtpu: 0.0.40
codegen_flags: <defaults>
</compile_context>

<pallas_src>
import jax
import jax.numpy as jnp
import numpy as np
from jax.experimental import pallas as pl
from jax.experimental.pallas import tpu as pltpu

# ---- problem sizes ----
V = 32            # n_tokens
H = 8             # hid_size
H2 = 2 * H        # 16
B = 8             # sequences lane-packed per program (review: widen lanes)
NG = 2            # independent groups -> grid axis ("parallel", feeds v7x 2nd TC)
L = 24            # joke token sequence length
L1 = L - 1        # after conv1 (k=2)  -> 23
L2 = L1 - 2       # after conv2 (k=3)  -> 21
L3 = L2 - 4       # after conv3 (k=5)  -> 17
P = L3 // 2       # after MaxPool1d(2) -> 8   (LSTM timesteps)
NCLS = 5
BN_EPS = 1e-5

BH = B * H        # 64   (lane width of the LSTM state / conv3 output)
BH2 = B * H2      # 128  (lane width of conv1/conv2 outputs)
G4 = 4 * BH       # 256  (4 fused gates x batch)


def _align(x, a=16):
    return (x + a - 1) // a * a


# ---- packed bf16 parameter slab: (SLAB_ROWS, SLAB_W), row offsets 16-aligned ----
SLAB_W = G4                             # 256
OFF_C1W = 0                             # 2 taps x BH rows,  cols [0:BH2)
OFF_C1B = OFF_C1W + 2 * BH              # 128
OFF_C2W = _align(OFF_C1B + 1)           # 144   3 taps x BH2 rows, cols [0:BH2)
OFF_C2B = OFF_C2W + 3 * BH2             # 528
OFF_C3W = _align(OFF_C2B + 1)           # 544   5 taps x BH2 rows, cols [0:BH)
OFF_C3B = OFF_C3W + 5 * BH2             # 1184
OFF_WIH = _align(OFF_C3B + 1)           # 1200  (BH, G4) fused gate-major block-diag
OFF_WHH = OFF_WIH + BH                  # 1264
OFF_LB = OFF_WHH + BH                   # 1328  (1, G4)
OFF_F1W = _align(OFF_LB + 1)            # 1344  (H, H) fc1 with BN folded in
OFF_F1B = OFF_F1W + H                   # 1352
OFF_F2W = _align(OFF_F1B + 1)           # 1360  (H, NCLS)
OFF_F2B = OFF_F2W + H                   # 1368
SLAB_ROWS = _align(OFF_F2B + 1)         # 1376


def cnn_lstm_kernel(x_ref, p_ref, out_ref, x3_ref):
    # x_ref: (1, L, B*H) f32 embeddings, lanes = [seq0 hid | seq1 hid | ... ]
    # p_ref: (SLAB_ROWS, SLAB_W) bf16 packed parameters
    # x3_ref: (L3, BH) f32 VMEM scratch used for the strided-load max pool
    x = x_ref[0]                                             # (L, BH) f32

    def conv_relu(x, w_off, b_off, k, lout, cin_blk, cout_blk):
        # all k taps fused into ONE bf16 MXU dot:
        #   (lout, k*cin_blk) tap-concat activation @ row-stacked block-diag weights
        taps = jnp.concatenate([x[j:j + lout, :] for j in range(k)], axis=1)
        acc = jnp.dot(taps.astype(jnp.bfloat16),
                      p_ref[w_off:w_off + k * cin_blk, 0:cout_blk],
                      preferred_element_type=jnp.float32)
        acc = acc + p_ref[b_off:b_off + 1, 0:cout_blk]       # bias (bcast over rows)
        return jnp.maximum(acc, 0.0)

    x = conv_relu(x, OFF_C1W, OFF_C1B, 2, L1, BH, BH2)       # (23, 128)
    x = conv_relu(x, OFF_C2W, OFF_C2B, 3, L2, BH2, BH2)      # (21, 128)
    x = conv_relu(x, OFF_C3W, OFF_C3B, 5, L3, BH2, BH)       # (17, 64)

    # ---- MaxPool1d(2): spill conv3 to scratch, two stride-2 sublane loads, one max
    x3_ref[...] = x
    pooled = jnp.maximum(x3_ref[pl.ds(0, P, stride=2), :],
                         x3_ref[pl.ds(1, P, stride=2), :])   # (P, BH) f32

    # ---- LSTM: hoisted input projection + fused-gate recurrence (order i,f,o,g) ----
    whh = p_ref[OFF_WHH:OFF_WHH + BH, 0:G4]                  # (64, 256) bf16
    xproj = (jnp.dot(pooled.astype(jnp.bfloat16),
                     p_ref[OFF_WIH:OFF_WIH + BH, 0:G4],
                     preferred_element_type=jnp.float32)
             + p_ref[OFF_LB:OFF_LB + 1, 0:G4])               # (P, 256) f32

    h = jnp.zeros((1, BH), jnp.float32)
    c = jnp.zeros((1, BH), jnp.float32)
    for t in range(P):
        g_all = xproj[t:t + 1, :] + jnp.dot(h.astype(jnp.bfloat16), whh,
                                            preferred_element_type=jnp.float32)
        # sigmoid via tanh keeps the transcendental on the (otherwise idle) EUP slot
        sig = 0.5 * jnp.tanh(0.5 * g_all[:, 0:3 * BH]) + 0.5  # gates i, f, o
        gi = sig[:, 0:BH]
        gf = sig[:, BH:2 * BH]
        go = sig[:, 2 * BH:3 * BH]
        gg = jnp.tanh(g_all[:, 3 * BH:4 * BH])                # gate g
        c = gf * c + gi * gg
        h = go * jnp.tanh(c)

    # ---- Dropout (eval: identity) -> ReLU; split lane-packed h to (B, H) sublanes ----
    h = jnp.maximum(h, 0.0)
    h2 = jnp.concatenate([h[:, b * H:(b + 1) * H] for b in range(B)], axis=0)  # (B, H)

    # ---- fc1 (BatchNorm folded) -> ELU -> fc2 -> Softmax (row-wise, all B at once) ----
    z = (jnp.dot(h2.astype(jnp.bfloat16), p_ref[OFF_F1W:OFF_F1W + H, 0:H],
                 preferred_element_type=jnp.float32)
         + p_ref[OFF_F1B:OFF_F1B + 1, 0:H])
    z = jnp.where(z > 0, z, jnp.exp(z) - 1.0)                 # ELU(alpha=1)
    logits = (jnp.dot(z.astype(jnp.bfloat16), p_ref[OFF_F2W:OFF_F2W + H, 0:NCLS],
                      preferred_element_type=jnp.float32)
              + p_ref[OFF_F2B:OFF_F2B + 1, 0:NCLS])
    m = jnp.max(logits, axis=-1, keepdims=True)
    e = jnp.exp(logits - m)
    inv = pl.reciprocal(jnp.sum(e, axis=-1, keepdims=True), approx=True)
    out_ref[0] = e * inv                                      # (B, NCLS)


def pack_params(params):
    """Fold BN into fc1, fuse/reorder LSTM gates, build block-diagonal-over-batch
    conv/LSTM weights, and pack everything into one bf16 (SLAB_ROWS, SLAB_W) slab."""
    p = {k: np.asarray(v, dtype=np.float32) for k, v in params.items()}
    slab = np.zeros((SLAB_ROWS, SLAB_W), np.float32)

    def put_conv(off_w, off_b, w, bias):
        k, cin, cout = w.shape
        cin_blk = B * cin
        for j in range(k):
            for b in range(B):
                r = off_w + j * cin_blk + b * cin
                slab[r:r + cin, b * cout:(b + 1) * cout] = w[j]
        for b in range(B):
            slab[off_b, b * cout:(b + 1) * cout] = bias

    put_conv(OFF_C1W, OFF_C1B, p["c1w"], p["c1b"])
    put_conv(OFF_C2W, OFF_C2B, p["c2w"], p["c2b"])
    put_conv(OFF_C3W, OFF_C3B, p["c3w"], p["c3b"])

    # LSTM fused weights: gate-major columns, block-diagonal over batch.
    # Fused gate order (i, f, o, g); canonical (PyTorch) order is (i, f, g, o).
    gate_perm = (0, 1, 3, 2)
    for slot, gc in enumerate(gate_perm):
        for b in range(B):
            cols = slice(slot * BH + b * H, slot * BH + (b + 1) * H)
            slab[OFF_WIH + b * H:OFF_WIH + (b + 1) * H, cols] = p["wih"][gc]
            slab[OFF_WHH + b * H:OFF_WHH + (b + 1) * H, cols] = p["whh"][gc]
            slab[OFF_LB, cols] = p["lb"][gc]

    # Head: fold eval-mode BatchNorm1d (running stats) into fc1.
    scale = p["bng"] / np.sqrt(p["bnv"] + BN_EPS)
    slab[OFF_F1W:OFF_F1W + H, 0:H] = p["fc1w"] * scale[None, :]
    slab[OFF_F1B, 0:H] = p["fc1b"] * scale + p["bnb"] - p["bnm"] * scale
    slab[OFF_F2W:OFF_F2W + H, 0:NCLS] = p["fc2w"]
    slab[OFF_F2B, 0:NCLS] = p["fc2b"]
    return jnp.asarray(slab, dtype=jnp.bfloat16)


def cnn_lstm_forward(tokens, emb_table, slab):
    # tokens: (NG, B, L) int32. Embedding gather in the wrapper, emitting the
    # lane-concatenated channels-last layout (NG, L, B*H).
    x = jnp.take(emb_table, tokens, axis=0)                   # (NG, B, L, H)
    x = jnp.transpose(x, (0, 2, 1, 3)).reshape(NG, L, B * H)  # (NG, L, B*H) f32

    grid_spec = pltpu.PrefetchScalarGridSpec(
        num_scalar_prefetch=0,
        grid=(NG,),
        in_specs=[pl.BlockSpec((1, L, BH), lambda g: (g, 0, 0)),
                  pl.BlockSpec((SLAB_ROWS, SLAB_W), lambda g: (0, 0))],
        out_specs=pl.BlockSpec((1, B, NCLS), lambda g: (g, 0, 0)),
        scratch_shapes=[pltpu.VMEM((L3, BH), jnp.float32)])

    return pl.pallas_call(
        cnn_lstm_kernel,
        out_shape=jax.ShapeDtypeStruct((NG, B, NCLS), jnp.float32),
        grid_spec=grid_spec,
        compiler_params=pltpu.CompilerParams(
            dimension_semantics=("parallel",)),
    )(x, slab)


def init_params(key):
    ks = jax.random.split(key, 16)

    def rnd(k, shape, scale=0.1):
        return (scale * jax.random.normal(k, shape)).astype(jnp.float32)

    return {
        "emb": rnd(ks[0], (V, H), 1.0),
        # Conv1d weights stored as (k, Cin, Cout) (== torch weight.transpose(2,1,0))
        "c1w": rnd(ks[1], (2, H, H2)),  "c1b": rnd(ks[2], (H2,)),
        "c2w": rnd(ks[3], (3, H2, H2)), "c2b": rnd(ks[4], (H2,)),
        "c3w": rnd(ks[5], (5, H2, H)),  "c3b": rnd(ks[6], (H,)),
        # LSTM, canonical gate order (i, f, g, o); bias = b_ih + b_hh
        "wih": rnd(ks[7], (4, H, H)), "whh": rnd(ks[8], (4, H, H)), "lb": rnd(ks[9], (4, H)),
        # final predictor
        "fc1w": rnd(ks[10], (H, H)), "fc1b": rnd(ks[11], (H,)),
        "bng": jnp.ones((H,), jnp.float32), "bnb": jnp.zeros((H,), jnp.float32),
        "bnm": jnp.zeros((H,), jnp.float32), "bnv": jnp.ones((H,), jnp.float32),
        "fc2w": rnd(ks[12], (H, NCLS)), "fc2b": rnd(ks[13], (NCLS,)),
    }


def reference_forward(tokens_flat, params):
    """Pure-JAX f32 reference with the canonical (un-fused, un-folded) parameters."""
    x = params["emb"][tokens_flat]                            # (BT, L, H)

    def conv(x, w, b):
        k = w.shape[0]
        lout = x.shape[1] - k + 1
        acc = sum(jnp.einsum("blc,cd->bld", x[:, j:j + lout, :], w[j]) for j in range(k))
        return jax.nn.relu(acc + b[None, None, :])

    x = conv(x, params["c1w"], params["c1b"])
    x = conv(x, params["c2w"], params["c2b"])
    x = conv(x, params["c3w"], params["c3b"])
    x = jnp.maximum(x[:, 0:2 * P:2, :], x[:, 1:2 * P:2, :])   # MaxPool1d(2)

    bt = x.shape[0]
    h = jnp.zeros((bt, H), jnp.float32)
    c = jnp.zeros((bt, H), jnp.float32)
    for t in range(P):
        xt = x[:, t, :]
        gi = jax.nn.sigmoid(xt @ params["wih"][0] + h @ params["whh"][0] + params["lb"][0])
        gf = jax.nn.sigmoid(xt @ params["wih"][1] + h @ params["whh"][1] + params["lb"][1])
        gg = jnp.tanh(xt @ params["wih"][2] + h @ params["whh"][2] + params["lb"][2])
        go = jax.nn.sigmoid(xt @ params["wih"][3] + h @ params["whh"][3] + params["lb"][3])
        c = gf * c + gi * gg
        h = go * jnp.tanh(c)

    h = jax.nn.relu(h)
    z = h @ params["fc1w"] + params["fc1b"]
    z = (z - params["bnm"]) / jnp.sqrt(params["bnv"] + BN_EPS) * params["bng"] + params["bnb"]
    z = jnp.where(z > 0, z, jnp.exp(z) - 1.0)
    logits = z @ params["fc2w"] + params["fc2b"]
    return jax.nn.softmax(logits, axis=-1)


if __name__ == "__main__":
    key = jax.random.PRNGKey(0)
    k_tok, k_par = jax.random.split(key)
    tokens = jax.random.randint(k_tok, (NG, B, L), 0, V, dtype=jnp.int32)
    params = init_params(k_par)
    slab = pack_params(params)

    fwd = jax.jit(cnn_lstm_forward)
    out = jax.block_until_ready(fwd(tokens, params["emb"], slab))
    out_np = np.asarray(out).reshape(NG * B, NCLS)

    assert out_np.shape == (NG * B, NCLS)
    assert np.all(np.isfinite(out_np))
    # approx reciprocal in the softmax denominator -> slightly loose sum check
    assert np.allclose(out_np.sum(axis=-1), 1.0, atol=5e-3)

    ref = np.asarray(reference_forward(tokens.reshape(NG * B, L), params))
    # bf16 weights/activations into the MXU + approx reciprocal -> loose tolerance
    assert np.allclose(out_np, ref, atol=3e-2), float(np.abs(out_np - ref).max())
    print("KERNEL_OK")
</pallas_src>

<mosaic_0001>
module attributes {stable_mosaic.version = 11 : i64} {
  func.func @cnn_lstm_kernel(%arg0: i32, %arg1: memref<1x24x64xf32, #tpu.memory_space<vmem>>, %arg2: memref<1376x256xbf16, #tpu.memory_space<vmem>>, %arg3: memref<1x8x5xf32, #tpu.memory_space<vmem>>, %arg4: memref<17x64xf32, #tpu.memory_space<vmem>>) attributes {dimension_semantics = [#tpu.dimension_semantics<parallel>], iteration_bounds = array<i64: 2>, scalar_prefetch = 0 : i64, scratch_operands = 1 : i64, tpu.core_type = #tpu.core_type<tc>, window_params = [{transform_indices = @transform_0, window_bounds = array<i64: 1, 24, 64>}, {pipeline_mode = #tpu.pipeline_mode<synchronous>, transform_indices = @transform_1, window_bounds = array<i64: 1376, 256>}, {transform_indices = @transform_2, window_bounds = array<i64: 1, 8, 5>}]} {
    %c0 = arith.constant 0 : index
    %c0_0 = arith.constant 0 : index
    %c0_1 = arith.constant 0 : index
    %0 = vector.load %arg1[%c0, %c0_0, %c0_1] : memref<1x24x64xf32, #tpu.memory_space<vmem>>, vector<1x24x64xf32>
    %1 = vector.shape_cast %0 : vector<1x24x64xf32> to vector<24x64xf32>
    %2 = vector.extract_strided_slice %1 {offsets = [0, 0], sizes = [23, 64], strides = [1, 1]} : vector<24x64xf32> to vector<23x64xf32>
    %3 = vector.extract_strided_slice %1 {offsets = [1, 0], sizes = [23, 64], strides = [1, 1]} : vector<24x64xf32> to vector<23x64xf32>
    %4 = tpu.concatenate %2, %3 in 1 : vector<23x64xf32>, vector<23x64xf32> -> vector<23x128xf32>
    %5 = arith.truncf %4 : vector<23x128xf32> to vector<23x128xbf16>
    %c0_2 = arith.constant 0 : index
    %c0_3 = arith.constant 0 : index
    %6 = vector.load %arg2[%c0_2, %c0_3] : memref<1376x256xbf16, #tpu.memory_space<vmem>>, vector<128x128xbf16>
    %cst = arith.constant dense<0.000000e+00> : vector<23x128xf32>
    %7 = tpu.matmul %5, %6, %cst {dimension_numbers = #tpu.dot_dimension_numbers<[1], [0], [0], [1], [0, 0, 1, 1], [], []>} : vector<23x128xbf16>, vector<128x128xbf16>, vector<23x128xf32> -> vector<23x128xf32>
    %c128 = arith.constant 128 : index
    %c0_4 = arith.constant 0 : index
    %8 = vector.load %arg2[%c128, %c0_4] : memref<1376x256xbf16, #tpu.memory_space<vmem>>, vector<1x128xbf16>
    %9 = arith.extf %8 : vector<1x128xbf16> to vector<1x128xf32>
    %10 = vector.broadcast %9 : vector<1x128xf32> to vector<23x128xf32>
    %11 = arith.addf %7, %10 : vector<23x128xf32>
    %cst_5 = arith.constant 0.000000e+00 : f32
    %12 = vector.broadcast %cst_5 : f32 to vector<23x128xf32>
    %13 = arith.maximumf %11, %12 : vector<23x128xf32>
    %14 = vector.extract_strided_slice %13 {offsets = [0, 0], sizes = [21, 128], strides = [1, 1]} : vector<23x128xf32> to vector<21x128xf32>
    %15 = vector.extract_strided_slice %13 {offsets = [1, 0], sizes = [21, 128], strides = [1, 1]} : vector<23x128xf32> to vector<21x128xf32>
    %16 = vector.extract_strided_slice %13 {offsets = [2, 0], sizes = [21, 128], strides = [1, 1]} : vector<23x128xf32> to vector<21x128xf32>
    %17 = tpu.concatenate %14, %15, %16 in 1 : vector<21x128xf32>, vector<21x128xf32>, vector<21x128xf32> -> vector<21x384xf32>
    %18 = arith.truncf %17 : vector<21x384xf32> to vector<21x384xbf16>
    %c144 = arith.constant 144 : index
    %c0_6 = arith.constant 0 : index
    %19 = vector.load %arg2[%c144, %c0_6] : memref<1376x256xbf16, #tpu.memory_space<vmem>>, vector<384x128xbf16>
    %cst_7 = arith.constant dense<0.000000e+00> : vector<21x128xf32>
    %20 = tpu.matmul %18, %19, %cst_7 {dimension_numbers = #tpu.dot_dimension_numbers<[1], [0], [0], [1], [0, 0, 1, 1], [], []>} : vector<21x384xbf16>, vector<384x128xbf16>, vector<21x128xf32> -> vector<21x128xf32>
    %c528 = arith.constant 528 : index
    %c0_8 = arith.constant 0 : index
    %21 = vector.load %arg2[%c528, %c0_8] : memref<1376x256xbf16, #tpu.memory_space<vmem>>, vector<1x128xbf16>
    %22 = arith.extf %21 : vector<1x128xbf16> to vector<1x128xf32>
    %23 = vector.broadcast %22 : vector<1x128xf32> to vector<21x128xf32>
    %24 = arith.addf %20, %23 : vector<21x128xf32>
    %cst_9 = arith.constant 0.000000e+00 : f32
    %25 = vector.broadcast %cst_9 : f32 to vector<21x128xf32>
    %26 = arith.maximumf %24, %25 : vector<21x128xf32>
    %27 = vector.extract_strided_slice %26 {offsets = [0, 0], sizes = [17, 128], strides = [1, 1]} : vector<21x128xf32> to vector<17x128xf32>
    %28 = vector.extract_strided_slice %26 {offsets = [1, 0], sizes = [17, 128], strides = [1, 1]} : vector<21x128xf32> to vector<17x128xf32>
    %29 = vector.extract_strided_slice %26 {offsets = [2, 0], sizes = [17, 128], strides = [1, 1]} : vector<21x128xf32> to vector<17x128xf32>
    %30 = vector.extract_strided_slice %26 {offsets = [3, 0], sizes = [17, 128], strides = [1, 1]} : vector<21x128xf32> to vector<17x128xf32>
    %31 = vector.extract_strided_slice %26 {offsets = [4, 0], sizes = [17, 128], strides = [1, 1]} : vector<21x128xf32> to vector<17x128xf32>
    %32 = tpu.concatenate %27, %28, %29, %30, %31 in 1 : vector<17x128xf32>, vector<17x128xf32>, vector<17x128xf32>, vector<17x128xf32>, vector<17x128xf32> -> vector<17x640xf32>
    %33 = arith.truncf %32 : vector<17x640xf32> to vector<17x640xbf16>
    %c544 = arith.constant 544 : index
    %c0_10 = arith.constant 0 : index
    %34 = vector.load %arg2[%c544, %c0_10] : memref<1376x256xbf16, #tpu.memory_space<vmem>>, vector<640x64xbf16>
    %cst_11 = arith.constant dense<0.000000e+00> : vector<17x64xf32>
    %35 = tpu.matmul %33, %34, %cst_11 {dimension_numbers = #tpu.dot_dimension_numbers<[1], [0], [0], [1], [0, 0, 1, 1], [], []>} : vector<17x640xbf16>, vector<640x64xbf16>, vector<17x64xf32> -> vector<17x64xf32>
    %c1184 = arith.constant 1184 : index
    %c0_12 = arith.constant 0 : index
    %36 = vector.load %arg2[%c1184, %c0_12] : memref<1376x256xbf16, #tpu.memory_space<vmem>>, vector<1x64xbf16>
    %37 = arith.extf %36 : vector<1x64xbf16> to vector<1x64xf32>
    %38 = vector.broadcast %37 : vector<1x64xf32> to vector<17x64xf32>
    %39 = arith.addf %35, %38 : vector<17x64xf32>
    %cst_13 = arith.constant 0.000000e+00 : f32
    %40 = vector.broadcast %cst_13 : f32 to vector<17x64xf32>
    %41 = arith.maximumf %39, %40 : vector<17x64xf32>
    %c0_14 = arith.constant 0 : index
    %c0_15 = arith.constant 0 : index
    %42 = vector.load %arg4[%c0_14, %c0_15] : memref<17x64xf32, #tpu.memory_space<vmem>>, vector<17x64xf32>
    tpu.vector_store %arg4[%c0_14, %c0_15], %41 {strides = array<i32>} : memref<17x64xf32, #tpu.memory_space<vmem>>, vector<17x64xf32>,
    %c0_16 = arith.constant 0 : index
    %c0_17 = arith.constant 0 : index
    %43 = tpu.strided_load %arg4[%c0_16, %c0_17] {strides = array<i32: 2, 1>} : memref<17x64xf32, #tpu.memory_space<vmem>>, vector<8x64xf32>
    %c1 = arith.constant 1 : index
    %c0_18 = arith.constant 0 : index
    %44 = tpu.strided_load %arg4[%c1, %c0_18] {strides = array<i32: 2, 1>} : memref<17x64xf32, #tpu.memory_space<vmem>>, vector<8x64xf32>
    %45 = arith.maximumf %43, %44 : vector<8x64xf32>
    %c1264 = arith.constant 1264 : index
    %c0_19 = arith.constant 0 : index
    %46 = vector.load %arg2[%c1264, %c0_19] : memref<1376x256xbf16, #tpu.memory_space<vmem>>, vector<64x256xbf16>
    %47 = arith.truncf %45 : vector<8x64xf32> to vector<8x64xbf16>
    %c1200 = arith.constant 1200 : index
    %c0_20 = arith.constant 0 : index
    %48 = vector.load %arg2[%c1200, %c0_20] : memref<1376x256xbf16, #tpu.memory_space<vmem>>, vector<64x256xbf16>
    %cst_21 = arith.constant dense<0.000000e+00> : vector<8x256xf32>
    %49 = tpu.matmul %47, %48, %cst_21 {dimension_numbers = #tpu.dot_dimension_numbers<[1], [0], [0], [1], [0, 0, 1, 1], [], []>} : vector<8x64xbf16>, vector<64x256xbf16>, vector<8x256xf32> -> vector<8x256xf32>
    %c1328 = arith.constant 1328 : index
    %c0_22 = arith.constant 0 : index
    %50 = vector.load %arg2[%c1328, %c0_22] : memref<1376x256xbf16, #tpu.memory_space<vmem>>, vector<1x256xbf16>
    %51 = arith.extf %50 : vector<1x256xbf16> to vector<1x256xf32>
    %52 = vector.broadcast %51 : vector<1x256xf32> to vector<8x256xf32>
    %53 = arith.addf %49, %52 : vector<8x256xf32>
    %cst_23 = arith.constant 0.000000e+00 : f32
    %54 = vector.broadcast %cst_23 : f32 to vector<1x64xf32>
    %cst_24 = arith.constant 0.000000e+00 : f32
    %55 = vector.broadcast %cst_24 : f32 to vector<1x64xf32>
    %56 = vector.extract_strided_slice %53 {offsets = [0, 0], sizes = [1, 256], strides = [1, 1]} : vector<8x256xf32> to vector<1x256xf32>
    %57 = arith.truncf %54 : vector<1x64xf32> to vector<1x64xbf16>
    %cst_25 = arith.constant dense<0.000000e+00> : vector<1x256xf32>
    %58 = tpu.matmul %57, %46, %cst_25 {dimension_numbers = #tpu.dot_dimension_numbers<[1], [0], [0], [1], [0, 0, 1, 1], [], []>} : vector<1x64xbf16>, vector<64x256xbf16>, vector<1x256xf32> -> vector<1x256xf32>
    %59 = arith.addf %56, %58 : vector<1x256xf32>
    %60 = vector.extract_strided_slice %59 {offsets = [0, 0], sizes = [1, 192], strides = [1, 1]} : vector<1x256xf32> to vector<1x192xf32>
    %cst_26 = arith.constant 5.000000e-01 : f32
    %61 = vector.broadcast %cst_26 : f32 to vector<1x192xf32>
    %62 = arith.mulf %61, %60 : vector<1x192xf32>
    %63 = math.tanh %62 : vector<1x192xf32>
    %cst_27 = arith.constant 5.000000e-01 : f32
    %64 = vector.broadcast %cst_27 : f32 to vector<1x192xf32>
    %65 = arith.mulf %64, %63 : vector<1x192xf32>
    %cst_28 = arith.constant 5.000000e-01 : f32
    %66 = vector.broadcast %cst_28 : f32 to vector<1x192xf32>
    %67 = arith.addf %65, %66 : vector<1x192xf32>
    %68 = vector.extract_strided_slice %67 {offsets = [0, 0], sizes = [1, 64], strides = [1, 1]} : vector<1x192xf32> to vector<1x64xf32>
    %69 = vector.extract_strided_slice %67 {offsets = [0, 64], sizes = [1, 64], strides = [1, 1]} : vector<1x192xf32> to vector<1x64xf32>
    %70 = vector.extract_strided_slice %67 {offsets = [0, 128], sizes = [1, 64], strides = [1, 1]} : vector<1x192xf32> to vector<1x64xf32>
    %71 = vector.extract_strided_slice %59 {offsets = [0, 192], sizes = [1, 64], strides = [1, 1]} : vector<1x256xf32> to vector<1x64xf32>
    %72 = math.tanh %71 : vector<1x64xf32>
    %73 = arith.mulf %69, %55 : vector<1x64xf32>
    %74 = arith.mulf %68, %72 : vector<1x64xf32>
    %75 = arith.addf %73, %74 : vector<1x64xf32>
    %76 = math.tanh %75 : vector<1x64xf32>
    %77 = arith.mulf %70, %76 : vector<1x64xf32>
    %78 = vector.extract_strided_slice %53 {offsets = [1, 0], sizes = [1, 256], strides = [1, 1]} : vector<8x256xf32> to vector<1x256xf32>
    %79 = arith.truncf %77 : vector<1x64xf32> to vector<1x64xbf16>
    %cst_29 = arith.constant dense<0.000000e+00> : vector<1x256xf32>
    %80 = tpu.matmul %79, %46, %cst_29 {dimension_numbers = #tpu.dot_dimension_numbers<[1], [0], [0], [1], [0, 0, 1, 1], [], []>} : vector<1x64xbf16>, vector<64x256xbf16>, vector<1x256xf32> -> vector<1x256xf32>
    %81 = arith.addf %78, %80 : vector<1x256xf32>
    %82 = vector.extract_strided_slice %81 {offsets = [0, 0], sizes = [1, 192], strides = [1, 1]} : vector<1x256xf32> to vector<1x192xf32>
    %cst_30 = arith.constant 5.000000e-01 : f32
    %83 = vector.broadcast %cst_30 : f32 to vector<1x192xf32>
    %84 = arith.mulf %83, %82 : vector<1x192xf32>
    %85 = math.tanh %84 : vector<1x192xf32>
    %cst_31 = arith.constant 5.000000e-01 : f32
    %86 = vector.broadcast %cst_31 : f32 to vector<1x192xf32>
    %87 = arith.mulf %86, %85 : vector<1x192xf32>
    %cst_32 = arith.constant 5.000000e-01 : f32
    %88 = vector.broadcast %cst_32 : f32 to vector<1x192xf32>
    %89 = arith.addf %87, %88 : vector<1x192xf32>
    %90 = vector.extract_strided_slice %89 {offsets = [0, 0], sizes = [1, 64], strides = [1, 1]} : vector<1x192xf32> to vector<1x64xf32>
    %91 = vector.extract_strided_slice %89 {offsets = [0, 64], sizes = [1, 64], strides = [1, 1]} : vector<1x192xf32> to vector<1x64xf32>
    %92 = vector.extract_strided_slice %89 {offsets = [0, 128], sizes = [1, 64], strides = [1, 1]} : vector<1x192xf32> to vector<1x64xf32>
    %93 = vector.extract_strided_slice %81 {offsets = [0, 192], sizes = [1, 64], strides = [1, 1]} : vector<1x256xf32> to vector<1x64xf32>
    %94 = math.tanh %93 : vector<1x64xf32>
    %95 = arith.mulf %91, %75 : vector<1x64xf32>
    %96 = arith.mulf %90, %94 : vector<1x64xf32>
    %97 = arith.addf %95, %96 : vector<1x64xf32>
    %98 = math.tanh %97 : vector<1x64xf32>
    %99 = arith.mulf %92, %98 : vector<1x64xf32>
    %100 = vector.extract_strided_slice %53 {offsets = [2, 0], sizes = [1, 256], strides = [1, 1]} : vector<8x256xf32> to vector<1x256xf32>
    %101 = arith.truncf %99 : vector<1x64xf32> to vector<1x64xbf16>
    %cst_33 = arith.constant dense<0.000000e+00> : vector<1x256xf32>
    %102 = tpu.matmul %101, %46, %cst_33 {dimension_numbers = #tpu.dot_dimension_numbers<[1], [0], [0], [1], [0, 0, 1, 1], [], []>} : vector<1x64xbf16>, vector<64x256xbf16>, vector<1x256xf32> -> vector<1x256xf32>
    %103 = arith.addf %100, %102 : vector<1x256xf32>
    %104 = vector.extract_strided_slice %103 {offsets = [0, 0], sizes = [1, 192], strides = [1, 1]} : vector<1x256xf32> to vector<1x192xf32>
    %cst_34 = arith.constant 5.000000e-01 : f32
    %105 = vector.broadcast %cst_34 : f32 to vector<1x192xf32>
    %106 = arith.mulf %105, %104 : vector<1x192xf32>
    %107 = math.tanh %106 : vector<1x192xf32>
    %cst_35 = arith.constant 5.000000e-01 : f32
    %108 = vector.broadcast %cst_35 : f32 to vector<1x192xf32>
    %109 = arith.mulf %108, %107 : vector<1x192xf32>
    %cst_36 = arith.constant 5.000000e-01 : f32
    %110 = vector.broadcast %cst_36 : f32 to vector<1x192xf32>
    %111 = arith.addf %109, %110 : vector<1x192xf32>
    %112 = vector.extract_strided_slice %111 {offsets = [0, 0], sizes = [1, 64], strides = [1, 1]} : vector<1x192xf32> to vector<1x64xf32>
    %113 = vector.extract_strided_slice %111 {offsets = [0, 64], sizes = [1, 64], strides = [1, 1]} : vector<1x192xf32> to vector<1x64xf32>
    %114 = vector.extract_strided_slice %111 {offsets = [0, 128], sizes = [1, 64], strides = [1, 1]} : vector<1x192xf32> to vector<1x64xf32>
    %115 = vector.extract_strided_slice %103 {offsets = [0, 192], sizes = [1, 64], strides = [1, 1]} : vector<1x256xf32> to vector<1x64xf32>
    %116 = math.tanh %115 : vector<1x64xf32>
    %117 = arith.mulf %113, %97 : vector<1x64xf32>
    %118 = arith.mulf %112, %116 : vector<1x64xf32>
    %119 = arith.addf %117, %118 : vector<1x64xf32>
    %120 = math.tanh %119 : vector<1x64xf32>
    %121 = arith.mulf %114, %120 : vector<1x64xf32>
    %122 = vector.extract_strided_slice %53 {offsets = [3, 0], sizes = [1, 256], strides = [1, 1]} : vector<8x256xf32> to vector<1x256xf32>
    %123 = arith.truncf %121 : vector<1x64xf32> to vector<1x64xbf16>
    %cst_37 = arith.constant dense<0.000000e+00> : vector<1x256xf32>
    %124 = tpu.matmul %123, %46, %cst_37 {dimension_numbers = #tpu.dot_dimension_numbers<[1], [0], [0], [1], [0, 0, 1, 1], [], []>} : vector<1x64xbf16>, vector<64x256xbf16>, vector<1x256xf32> -> vector<1x256xf32>
    %125 = arith.addf %122, %124 : vector<1x256xf32>
    %126 = vector.extract_strided_slice %125 {offsets = [0, 0], sizes = [1, 192], strides = [1, 1]} : vector<1x256xf32> to vector<1x192xf32>
    %cst_38 = arith.constant 5.000000e-01 : f32
    %127 = vector.broadcast %cst_38 : f32 to vector<1x192xf32>
    %128 = arith.mulf %127, %126 : vector<1x192xf32>
    %129 = math.tanh %128 : vector<1x192xf32>
    %cst_39 = arith.constant 5.000000e-01 : f32
    %130 = vector.broadcast %cst_39 : f32 to vector<1x192xf32>
    %131 = arith.mulf %130, %129 : vector<1x192xf32>
    %cst_40 = arith.constant 5.000000e-01 : f32
    %132 = vector.broadcast %cst_40 : f32 to vector<1x192xf32>
    %133 = arith.addf %131, %132 : vector<1x192xf32>
    %134 = vector.extract_strided_slice %133 {offsets = [0, 0], sizes = [1, 64], strides = [1, 1]} : vector<1x192xf32> to vector<1x64xf32>
    %135 = vector.extract_strided_slice %133 {offsets = [0, 64], sizes = [1, 64], strides = [1, 1]} : vector<1x192xf32> to vector<1x64xf32>
    %136 = vector.extract_strided_slice %133 {offsets = [0, 128], sizes = [1, 64], strides = [1, 1]} : vector<1x192xf32> to vector<1x64xf32>
    %137 = vector.extract_strided_slice %125 {offsets = [0, 192], sizes = [1, 64], strides = [1, 1]} : vector<1x256xf32> to vector<1x64xf32>
    %138 = math.tanh %137 : vector<1x64xf32>
    %139 = arith.mulf %135, %119 : vector<1x64xf32>
    %140 = arith.mulf %134, %138 : vector<1x64xf32>
    %141 = arith.addf %139, %140 : vector<1x64xf32>
    %142 = math.tanh %141 : vector<1x64xf32>
    %143 = arith.mulf %136, %142 : vector<1x64xf32>
    %144 = vector.extract_strided_slice %53 {offsets = [4, 0], sizes = [1, 256], strides = [1, 1]} : vector<8x256xf32> to vector<1x256xf32>
    %145 = arith.truncf %143 : vector<1x64xf32> to vector<1x64xbf16>
    %cst_41 = arith.constant dense<0.000000e+00> : vector<1x256xf32>
    %146 = tpu.matmul %145, %46, %cst_41 {dimension_numbers = #tpu.dot_dimension_numbers<[1], [0], [0], [1], [0, 0, 1, 1], [], []>} : vector<1x64xbf16>, vector<64x256xbf16>, vector<1x256xf32> -> vector<1x256xf32>
    %147 = arith.addf %144, %146 : vector<1x256xf32>
    %148 = vector.extract_strided_slice %147 {offsets = [0, 0], sizes = [1, 192], strides = [1, 1]} : vector<1x256xf32> to vector<1x192xf32>
    %cst_42 = arith.constant 5.000000e-01 : f32
    %149 = vector.broadcast %cst_42 : f32 to vector<1x192xf32>
    %150 = arith.mulf %149, %148 : vector<1x192xf32>
    %151 = math.tanh %150 : vector<1x192xf32>
    %cst_43 = arith.constant 5.000000e-01 : f32
    %152 = vector.broadcast %cst_43 : f32 to vector<1x192xf32>
    %153 = arith.mulf %152, %151 : vector<1x192xf32>
    %cst_44 = arith.constant 5.000000e-01 : f32
    %154 = vector.broadcast %cst_44 : f32 to vector<1x192xf32>
    %155 = arith.addf %153, %154 : vector<1x192xf32>
    %156 = vector.extract_strided_slice %155 {offsets = [0, 0], sizes = [1, 64], strides = [1, 1]} : vector<1x192xf32> to vector<1x64xf32>
    %157 = vector.extract_strided_slice %155 {offsets = [0, 64], sizes = [1, 64], strides = [1, 1]} : vector<1x192xf32> to vector<1x64xf32>
    %158 = vector.extract_strided_slice %155 {offsets = [0, 128], sizes = [1, 64], strides = [1, 1]} : vector<1x192xf32> to vector<1x64xf32>
    %159 = vector.extract_strided_slice %147 {offsets = [0, 192], sizes = [1, 64], strides = [1, 1]} : vector<1x256xf32> to vector<1x64xf32>
    %160 = math.tanh %159 : vector<1x64xf32>
    %161 = arith.mulf %157, %141 : vector<1x64xf32>
    %162 = arith.mulf %156, %160 : vector<1x64xf32>
    %163 = arith.addf %161, %162 : vector<1x64xf32>
    %164 = math.tanh %163 : vector<1x64xf32>
    %165 = arith.mulf %158, %164 : vector<1x64xf32>
    %166 = vector.extract_strided_slice %53 {offsets = [5, 0], sizes = [1, 256], strides = [1, 1]} : vector<8x256xf32> to vector<1x256xf32>
    %167 = arith.truncf %165 : vector<1x64xf32> to vector<1x64xbf16>
    %cst_45 = arith.constant dense<0.000000e+00> : vector<1x256xf32>
    %168 = tpu.matmul %167, %46, %cst_45 {dimension_numbers = #tpu.dot_dimension_numbers<[1], [0], [0], [1], [0, 0, 1, 1], [], []>} : vector<1x64xbf16>, vector<64x256xbf16>, vector<1x256xf32> -> vector<1x256xf32>
    %169 = arith.addf %166, %168 : vector<1x256xf32>
    %170 = vector.extract_strided_slice %169 {offsets = [0, 0], sizes = [1, 192], strides = [1, 1]} : vector<1x256xf32> to vector<1x192xf32>
    %cst_46 = arith.constant 5.000000e-01 : f32
    %171 = vector.broadcast %cst_46 : f32 to vector<1x192xf32>
    %172 = arith.mulf %171, %170 : vector<1x192xf32>
    %173 = math.tanh %172 : vector<1x192xf32>
    %cst_47 = arith.constant 5.000000e-01 : f32
    %174 = vector.broadcast %cst_47 : f32 to vector<1x192xf32>
    %175 = arith.mulf %174, %173 : vector<1x192xf32>
    %cst_48 = arith.constant 5.000000e-01 : f32
    %176 = vector.broadcast %cst_48 : f32 to vector<1x192xf32>
    %177 = arith.addf %175, %176 : vector<1x192xf32>
    %178 = vector.extract_strided_slice %177 {offsets = [0, 0], sizes = [1, 64], strides = [1, 1]} : vector<1x192xf32> to vector<1x64xf32>
    %179 = vector.extract_strided_slice %177 {offsets = [0, 64], sizes = [1, 64], strides = [1, 1]} : vector<1x192xf32> to vector<1x64xf32>
    %180 = vector.extract_strided_slice %177 {offsets = [0, 128], sizes = [1, 64], strides = [1, 1]} : vector<1x192xf32> to vector<1x64xf32>
    %181 = vector.extract_strided_slice %169 {offsets = [0, 192], sizes = [1, 64], strides = [1, 1]} : vector<1x256xf32> to vector<1x64xf32>
    %182 = math.tanh %181 : vector<1x64xf32>
    %183 = arith.mulf %179, %163 : vector<1x64xf32>
    %184 = arith.mulf %178, %182 : vector<1x64xf32>
    %185 = arith.addf %183, %184 : vector<1x64xf32>
    %186 = math.tanh %185 : vector<1x64xf32>
    %187 = arith.mulf %180, %186 : vector<1x64xf32>
    %188 = vector.extract_strided_slice %53 {offsets = [6, 0], sizes = [1, 256], strides = [1, 1]} : vector<8x256xf32> to vector<1x256xf32>
    %189 = arith.truncf %187 : vector<1x64xf32> to vector<1x64xbf16>
    %cst_49 = arith.constant dense<0.000000e+00> : vector<1x256xf32>
    %190 = tpu.matmul %189, %46, %cst_49 {dimension_numbers = #tpu.dot_dimension_numbers<[1], [0], [0], [1], [0, 0, 1, 1], [], []>} : vector<1x64xbf16>, vector<64x256xbf16>, vector<1x256xf32> -> vector<1x256xf32>
    %191 = arith.addf %188, %190 : vector<1x256xf32>
    %192 = vector.extract_strided_slice %191 {offsets = [0, 0], sizes = [1, 192], strides = [1, 1]} : vector<1x256xf32> to vector<1x192xf32>
    %cst_50 = arith.constant 5.000000e-01 : f32
    %193 = vector.broadcast %cst_50 : f32 to vector<1x192xf32>
    %194 = arith.mulf %193, %192 : vector<1x192xf32>
    %195 = math.tanh %194 : vector<1x192xf32>
    %cst_51 = arith.constant 5.000000e-01 : f32
    %196 = vector.broadcast %cst_51 : f32 to vector<1x192xf32>
    %197 = arith.mulf %196, %195 : vector<1x192xf32>
    %cst_52 = arith.constant 5.000000e-01 : f32
    %198 = vector.broadcast %cst_52 : f32 to vector<1x192xf32>
    %199 = arith.addf %197, %198 : vector<1x192xf32>
    %200 = vector.extract_strided_slice %199 {offsets = [0, 0], sizes = [1, 64], strides = [1, 1]} : vector<1x192xf32> to vector<1x64xf32>
    %201 = vector.extract_strided_slice %199 {offsets = [0, 64], sizes = [1, 64], strides = [1, 1]} : vector<1x192xf32> to vector<1x64xf32>
    %202 = vector.extract_strided_slice %199 {offsets = [0, 128], sizes = [1, 64], strides = [1, 1]} : vector<1x192xf32> to vector<1x64xf32>
    %203 = vector.extract_strided_slice %191 {offsets = [0, 192], sizes = [1, 64], strides = [1, 1]} : vector<1x256xf32> to vector<1x64xf32>
    %204 = math.tanh %203 : vector<1x64xf32>
    %205 = arith.mulf %201, %185 : vector<1x64xf32>
    %206 = arith.mulf %200, %204 : vector<1x64xf32>
    %207 = arith.addf %205, %206 : vector<1x64xf32>
    %208 = math.tanh %207 : vector<1x64xf32>
    %209 = arith.mulf %202, %208 : vector<1x64xf32>
    %210 = vector.extract_strided_slice %53 {offsets = [7, 0], sizes = [1, 256], strides = [1, 1]} : vector<8x256xf32> to vector<1x256xf32>
    %211 = arith.truncf %209 : vector<1x64xf32> to vector<1x64xbf16>
    %cst_53 = arith.constant dense<0.000000e+00> : vector<1x256xf32>
    %212 = tpu.matmul %211, %46, %cst_53 {dimension_numbers = #tpu.dot_dimension_numbers<[1], [0], [0], [1], [0, 0, 1, 1], [], []>} : vector<1x64xbf16>, vector<64x256xbf16>, vector<1x256xf32> -> vector<1x256xf32>
    %213 = arith.addf %210, %212 : vector<1x256xf32>
    %214 = vector.extract_strided_slice %213 {offsets = [0, 0], sizes = [1, 192], strides = [1, 1]} : vector<1x256xf32> to vector<1x192xf32>
    %cst_54 = arith.constant 5.000000e-01 : f32
    %215 = vector.broadcast %cst_54 : f32 to vector<1x192xf32>
    %216 = arith.mulf %215, %214 : vector<1x192xf32>
    %217 = math.tanh %216 : vector<1x192xf32>
    %cst_55 = arith.constant 5.000000e-01 : f32
    %218 = vector.broadcast %cst_55 : f32 to vector<1x192xf32>
    %219 = arith.mulf %218, %217 : vector<1x192xf32>
    %cst_56 = arith.constant 5.000000e-01 : f32
    %220 = vector.broadcast %cst_56 : f32 to vector<1x192xf32>
    %221 = arith.addf %219, %220 : vector<1x192xf32>
    %222 = vector.extract_strided_slice %221 {offsets = [0, 0], sizes = [1, 64], strides = [1, 1]} : vector<1x192xf32> to vector<1x64xf32>
    %223 = vector.extract_strided_slice %221 {offsets = [0, 64], sizes = [1, 64], strides = [1, 1]} : vector<1x192xf32> to vector<1x64xf32>
    %224 = vector.extract_strided_slice %221 {offsets = [0, 128], sizes = [1, 64], strides = [1, 1]} : vector<1x192xf32> to vector<1x64xf32>
    %225 = vector.extract_strided_slice %213 {offsets = [0, 192], sizes = [1, 64], strides = [1, 1]} : vector<1x256xf32> to vector<1x64xf32>
    %226 = math.tanh %225 : vector<1x64xf32>
    %227 = arith.mulf %223, %207 : vector<1x64xf32>
    %228 = arith.mulf %222, %226 : vector<1x64xf32>
    %229 = arith.addf %227, %228 : vector<1x64xf32>
    %230 = math.tanh %229 : vector<1x64xf32>
    %231 = arith.mulf %224, %230 : vector<1x64xf32>
    %cst_57 = arith.constant 0.000000e+00 : f32
    %232 = vector.broadcast %cst_57 : f32 to vector<1x64xf32>
    %233 = arith.maximumf %231, %232 : vector<1x64xf32>
    %234 = vector.extract_strided_slice %233 {offsets = [0, 0], sizes = [1, 8], strides = [1, 1]} : vector<1x64xf32> to vector<1x8xf32>
    %235 = vector.extract_strided_slice %233 {offsets = [0, 8], sizes = [1, 8], strides = [1, 1]} : vector<1x64xf32> to vector<1x8xf32>
    %236 = vector.extract_strided_slice %233 {offsets = [0, 16], sizes = [1, 8], strides = [1, 1]} : vector<1x64xf32> to vector<1x8xf32>
    %237 = vector.extract_strided_slice %233 {offsets = [0, 24], sizes = [1, 8], strides = [1, 1]} : vector<1x64xf32> to vector<1x8xf32>
    %238 = vector.extract_strided_slice %233 {offsets = [0, 32], sizes = [1, 8], strides = [1, 1]} : vector<1x64xf32> to vector<1x8xf32>
    %239 = vector.extract_strided_slice %233 {offsets = [0, 40], sizes = [1, 8], strides = [1, 1]} : vector<1x64xf32> to vector<1x8xf32>
    %240 = vector.extract_strided_slice %233 {offsets = [0, 48], sizes = [1, 8], strides = [1, 1]} : vector<1x64xf32> to vector<1x8xf32>
    %241 = vector.extract_strided_slice %233 {offsets = [0, 56], sizes = [1, 8], strides = [1, 1]} : vector<1x64xf32> to vector<1x8xf32>
    %242 = tpu.concatenate %234, %235, %236, %237, %238, %239, %240, %241 in 0 : vector<1x8xf32>, vector<1x8xf32>, vector<1x8xf32>, vector<1x8xf32>, vector<1x8xf32>, vector<1x8xf32>, vector<1x8xf32>, vector<1x8xf32> -> vector<8x8xf32>
    %243 = arith.truncf %242 : vector<8x8xf32> to vector<8x8xbf16>
    %c1344 = arith.constant 1344 : index
    %c0_58 = arith.constant 0 : index
    %244 = vector.load %arg2[%c1344, %c0_58] : memref<1376x256xbf16, #tpu.memory_space<vmem>>, vector<8x8xbf16>
    %cst_59 = arith.constant dense<0.000000e+00> : vector<8x8xf32>
    %245 = tpu.matmul %243, %244, %cst_59 {dimension_numbers = #tpu.dot_dimension_numbers<[1], [0], [0], [1], [0, 0, 1, 1], [], []>} : vector<8x8xbf16>, vector<8x8xbf16>, vector<8x8xf32> -> vector<8x8xf32>
    %c1352 = arith.constant 1352 : index
    %c0_60 = arith.constant 0 : index
    %246 = vector.load %arg2[%c1352, %c0_60] : memref<1376x256xbf16, #tpu.memory_space<vmem>>, vector<1x8xbf16>
    %247 = arith.extf %246 : vector<1x8xbf16> to vector<1x8xf32>
    %248 = vector.broadcast %247 : vector<1x8xf32> to vector<8x8xf32>
    %249 = arith.addf %245, %248 : vector<8x8xf32>
    %cst_61 = arith.constant 0.000000e+00 : f32
    %250 = vector.broadcast %cst_61 : f32 to vector<8x8xf32>
    %251 = arith.cmpf ogt, %249, %250 : vector<8x8xf32>
    %252 = math.exp %249 : vector<8x8xf32>
    %cst_62 = arith.constant 1.000000e+00 : f32
    %253 = vector.broadcast %cst_62 : f32 to vector<8x8xf32>
    %254 = arith.subf %252, %253 : vector<8x8xf32>
    %255 = arith.select %251, %249, %254 : vector<8x8xi1>, vector<8x8xf32>
    %256 = arith.truncf %255 : vector<8x8xf32> to vector<8x8xbf16>
    %c1360 = arith.constant 1360 : index
    %c0_63 = arith.constant 0 : index
    %257 = vector.load %arg2[%c1360, %c0_63] : memref<1376x256xbf16, #tpu.memory_space<vmem>>, vector<8x5xbf16>
    %cst_64 = arith.constant dense<0.000000e+00> : vector<8x5xf32>
    %258 = tpu.matmul %256, %257, %cst_64 {dimension_numbers = #tpu.dot_dimension_numbers<[1], [0], [0], [1], [0, 0, 1, 1], [], []>} : vector<8x8xbf16>, vector<8x5xbf16>, vector<8x5xf32> -> vector<8x5xf32>
    %c1368 = arith.constant 1368 : index
    %c0_65 = arith.constant 0 : index
    %259 = vector.load %arg2[%c1368, %c0_65] : memref<1376x256xbf16, #tpu.memory_space<vmem>>, vector<1x5xbf16>
    %260 = arith.extf %259 : vector<1x5xbf16> to vector<1x5xf32>
    %261 = vector.broadcast %260 : vector<1x5xf32> to vector<8x5xf32>
    %262 = arith.addf %258, %261 : vector<8x5xf32>
    %cst_66 = arith.constant dense<0xFF800000> : vector<8xf32>
    %263 = vector.multi_reduction <maximumf>, %262, %cst_66 [1] : vector<8x5xf32> to vector<8xf32>
    %264 = vector.shape_cast %263 : vector<8xf32> to vector<8x1xf32>
    %265 = vector.broadcast %264 : vector<8x1xf32> to vector<8x5xf32>
    %266 = arith.subf %262, %265 : vector<8x5xf32>
    %267 = math.exp %266 : vector<8x5xf32>
    %cst_67 = arith.constant dense<0.000000e+00> : vector<8xf32>
    %268 = vector.multi_reduction <add>, %267, %cst_67 [1] : vector<8x5xf32> to vector<8xf32>
    %269 = vector.shape_cast %268 : vector<8xf32> to vector<8x1xf32>
    %270 = tpu.reciprocal %269 {approx = true} : vector<8x1xf32> -> vector<8x1xf32>
    %271 = vector.broadcast %270 : vector<8x1xf32> to vector<8x5xf32>
    %272 = arith.mulf %267, %271 : vector<8x5xf32>
    %c0_68 = arith.constant 0 : index
    %c0_69 = arith.constant 0 : index
    %c0_70 = arith.constant 0 : index
    %273 = vector.load %arg3[%c0_68, %c0_69, %c0_70] : memref<1x8x5xf32, #tpu.memory_space<vmem>>, vector<1x8x5xf32>
    %274 = vector.shape_cast %273 : vector<1x8x5xf32> to vector<8x5xf32>
    %275 = vector.shape_cast %272 : vector<8x5xf32> to vector<1x8x5xf32>
    tpu.vector_store %arg3[%c0_68, %c0_69, %c0_70], %275 {strides = array<i32>} : memref<1x8x5xf32, #tpu.memory_space<vmem>>, vector<1x8x5xf32>,
    return
  }
  func.func @transform_0(%arg0: i32) -> (i32, i32, i32) {
    %c0_i32 = arith.constant 0 : i32
    %c0_i32_0 = arith.constant 0 : i32
    %c0_i32_1 = arith.constant 0 : i32
    return %arg0, %c0_i32, %c0_i32_0 : i32, i32, i32
  }
  func.func @transform_1(%arg0: i32) -> (i32, i32) {
    %c0_i32 = arith.constant 0 : i32
    %c0_i32_0 = arith.constant 0 : i32
    %c0_i32_1 = arith.constant 0 : i32
    return %c0_i32, %c0_i32_0 : i32, i32
  }
  func.func @transform_2(%arg0: i32) -> (i32, i32, i32) {
    %c0_i32 = arith.constant 0 : i32
    %c0_i32_0 = arith.constant 0 : i32
    %c0_i32_1 = arith.constant 0 : i32
    return %arg0, %c0_i32, %c0_i32_0 : i32, i32, i32
  }
}

</mosaic_0001>

<bundles_post_ra>
// kernel: cnn_lstm_forward.1
= control target key start
LH: loop header
LB: loop body
LE: loop exit
PB: predicated region body
PF: predicated region fallthrough
CT: control target
= control target key end

     0   :  { %s2701_s9 = smov 0   ;;  %s3199_s0 = inlined_call_operand.vmem [shape: f32[2,24,64], index: 0, kind: input, shape index: {}]   ;;  %s3200_s1 = inlined_call_operand.vmem [shape: bf16[1376,256], index: 1, kind: input, shape index: {}]   ;;  %s3201_s2 = inlined_call_operand.vmem [shape: f32[2,8,5], index: 2, kind: output, shape index: {}]  }
   0x1 LB: > { %s2178_s10 = sadd.s32 4294967295, %s2673_s9   ;;  %p2182_p0 = scmp.ge.s32.totalorder %s2673_s9, 1  ;;  %s2673_s9 = sphi %s2701_s9, %s12_s9  }
   0x2   : > { %p112_p1 = scmp.lt.s32.totalorder %s2673_s9, 3 }
   0x4   : > { %p113_p2 = pnand %p2182_p0, %p112_p1 }
   0x5   : > { %p133_p3 = scmp.lt.s32.totalorder (!%p113_p2), %s2178_s10, 1  ;;  %v2501_v0 = vld [vmem:[%s3200_s1] ss:$8 sps:$4 sm:$0xff] (!%p113_p2)   ;;  %v2502_v1 = vld [vmem:[%s3200_s1 + $0x10] ss:$8 sps:$4 sm:$0xff] (!%p113_p2)   ;;  %vm149_vm0 = vcmask (!%p113_p2), 1046528   ;;  %v188_v52 = vlaneseq (!%p113_p2) }
   0x6   : > { %116 = sbr.rel (%p113_p2) target bundleno = 6513 (0x1971), region = 28  ;;  %2404 = vmatprep.subr.bf16.mxu0 (!%p113_p2), %v2501_v0  ;;  %v2503_v2 = vld [vmem:[%s3200_s1 + $0x20] ss:$8 sps:$4 sm:$0xff] (!%p113_p2)   ;;  %v2504_v9 = vld [vmem:[%s3200_s1 + $0x30] ss:$8 sps:$4 sm:$0xff] (!%p113_p2)   ;;  %s2675_s27 = smov (!%p113_p2), 64  }
   0x7   : > { %2405 = vmatpush3.bf16.msra.mxu0 (!%p113_p2), %v2501_v0  ;;  %v2509_v13 = vld [vmem:[%s3200_s1 + $0x110] ss:$8 sps:$4 sm:$0xff] (!%p113_p2)   ;;  %v2505_v14 = vld [vmem:[%s3200_s1 + $0x40] ss:$8 sps:$4 sm:$0xff] (!%p113_p2)   ;;  %vm164_vm1 = vcmask (!%p113_p2), 523264   ;;  %v189_v53 = vshrl.u32 (!%p113_p2), %v188_v52, 7 }
   0x8   : > { %2406 = vmatprep.subr.bf16.mxu0 (!%p113_p2), %v2502_v1  ;;  %v2511_v15 = vld [vmem:[%s3200_s1 + $0x90] ss:$8 sps:$4 sm:$0xff] (!%p113_p2)   ;;  %2296 = vmatprep.subr.bf16.mxu1 (!%p113_p2), %v2509_v13  ;;  %v2512_v16 = vld [vmem:[%s3200_s1 + $0x120] ss:$8 sps:$4 sm:$0xff] (!%p113_p2)   ;;  %vm302_vm2 = vcmask (!%p113_p2), 1045504   ;;  %vm633_vm3 = vcmask (!%p113_p2), 1044480  }
   0x9   : > { %v2506_v17 = vld [vmem:[%s3200_s1 + $0x50] ss:$8 sps:$4 sm:$0xff] (!%p113_p2)   ;;  %2297 = vmatpush3.bf16.msra.mxu1 (!%p113_p2), %v2511_v15  ;;  %v2514_v18 = vld [vmem:[%s3200_s1 + $0xa0] ss:$8 sps:$4 sm:$0xff] (!%p113_p2)   ;;  %v2827_v56 = vsub.s32 (!%p113_p2), 0, %v189_v53  ;;  %vm642_vm4 = vcmask (!%p113_p2), 1043456  }
   0xa   : > { %2298 = vmatprep.subr.bf16.mxu1 (!%p113_p2), %v2512_v16  ;;  %v2515_v19 = vld [vmem:[%s3200_s1 + $0x130] ss:$8 sps:$4 sm:$0xff] (!%p113_p2)   ;;  %v2518_v21 = vld [vmem:[%s3200_s1 + $0x140] ss:$8 sps:$4 sm:$0xff] (!%p113_p2)   ;;  %s2679_s26 = smov (!%p113_p2), 120   ;;  %vm2680_vm5 = vmmov (!%p113_p2), 0  }
   0xb   : > { %2407 = vmatpush3.bf16.msra.mxu0 (!%p113_p2), %v2502_v1  ;;  %v2517_v20 = vld [vmem:[%s3200_s1 + $0xb0] ss:$8 sps:$4 sm:$0xff] (!%p113_p2)   ;;  %v2507_v22 = vld [vmem:[%s3200_s1 + $0x60] ss:$8 sps:$4 sm:$0xff] (!%p113_p2)   ;;  %s2681_s28 = smov (!%p113_p2), 96   ;;  %s2682_s29 = smov (!%p113_p2), 104  }
   0xc   : > { %2408 = vmatprep.subr.bf16.mxu0 (!%p113_p2), %v2503_v2  ;;  %v2520_v23 = vld [vmem:[%s3200_s1 + $0xc0] ss:$8 sps:$4 sm:$0xff] (!%p113_p2)   ;;  %v2521_v24 = vld [vmem:[%s3200_s1 + $0x150] ss:$8 sps:$4 sm:$0xff] (!%p113_p2)   ;;  %s2683_s30 = smov (!%p113_p2), 80   ;;  %s2684_s3 = smov (!%p113_p2), 88  }
   0xd   : > { %s3203_s10 = smov (!%p133_p3, %s2178_s10), 1  ;;  %2299 = vmatpush3.bf16.msra.mxu1 %v2514_v18  ;;  %v2508_v25 = vld [vmem:[%s3200_s1 + $0x70] ss:$8 sps:$4 sm:$0xff]   ;;  %v2513_v37 = vld [vmem:[%s3200_s1 + $0x1a0] ss:$8 sps:$4 sm:$0xff]   ;;  %s2685_s4 = smov 72  }
   0xe   : > { %s2476_s15 = smul.u32 24, %s3203_s10  ;;  %2300 = vmatprep.subr.bf16.mxu1 %v2515_v19  ;;  %v2523_v26 = vld [vmem:[%s3200_s1 + $0xd0] ss:$8 sps:$4 sm:$0xff]   ;;  %v2519_v39 = vld [vmem:[%s3200_s1 + $0x1c0] ss:$8 sps:$4 sm:$0xff]   ;;  %vm1988_vm6 = vcmask 1040384  }
   0xf   : > { %2409 = vmatpush3.bf16.msra.mxu0 %v2503_v2  ;;  %v2510_v27 = vld [vmem:[%s3200_s1 + $0x190] ss:$8 sps:$4 sm:$0xff]   ;;  %v2524_v41 = vld [vmem:[%s3200_s1 + $0x160] ss:$8 sps:$4 sm:$0xff]   ;;  %vm1990_vm7 = vcmask 1041408   ;;  %vm1992_vm8 = vcmask 1042432  }
  0x10   : > { %s137_s20 = scalar_lea.vmem %s3199_s0, %s2476_s15  ;;  %2410 = vmatprep.subr.bf16.mxu0 %v2504_v9  ;;  %v2516_v38 = vld [vmem:[%s3200_s1 + $0x1b0] ss:$8 sps:$4 sm:$0xff]   ;;  %v2525_v42 = vld [vmem:[%s3200_s1 + $0x1e0] ss:$8 sps:$4 sm:$0xff]   ;;  %vm2006_vm9 = vcmask 64512   ;;  %vm2112_vm11 = vcmask 39936  }
  0x11   : > { %v143_v3 = vld [vmem:[%s137_s20] sm:$0xff]  ;;  %v144_v4 = vld [vmem:[%s137_s20 + $0x8] sm:$0xff]  ;;  %v145_v5 = vld [vmem:[%s137_s20 + $0x10] sm:$0xff]  ;;  %2301 = vmatpush3.bf16.msra.mxu1 %v2517_v20  ;;  %s2184_s13 = sshll.u32 %s3203_s10, 3 }
  0x12   : > { %v150_v6 = vrot.slane %v143_v3, 1  ;;  %v151_v7 = vrot.slane %v144_v4, 1  ;;  %v153_v8 = vrot.slane %v145_v5, 1  ;;  %2302 = vmatprep.subr.bf16.mxu1 %v2518_v21  ;;  %v2522_v40 = vld [vmem:[%s3200_s1 + $0x1d0] ss:$8 sps:$4 sm:$0xff]   ;;  %s141_s16 = scalar_lea.vmem %s3201_s2, %s2184_s13 }
  0x13   : > { %2411 = vmatpush3.bf16.msra.mxu0 %v2504_v9  ;;  %v2526_v43 = vld [vmem:[%s3200_s1 + $0xe0] ss:$8 sps:$4 sm:$0xff]   ;;  %v2527_v44 = vld [vmem:[%s3200_s1 + $0x170] ss:$8 sps:$4 sm:$0xff]  }
  0x14   : > { %v152_v10 = vsel %vm149_vm0, %v150_v6, %v151_v7  ;;  %v154_v11 = vsel %vm149_vm0, %v151_v7, %v153_v8  ;;  %2412 = vmatprep.subr.bf16.mxu0 %v2505_v14  ;;  %v2528_v45 = vld [vmem:[%s3200_s1 + $0x1f0] ss:$8 sps:$4 sm:$0xff]   ;;  %v2530_v47 = vld [vmem:[%s3200_s1 + $0x180] ss:$8 sps:$4 sm:$0xff]  }
  0x15   : > { %v2496_v12 = vpack.i.bf16 %v154_v11, %v152_v10  ;;  %2303 = vmatpush3.bf16.msra.mxu1 %v2520_v23  ;;  %v2529_v46 = vld [vmem:[%s3200_s1 + $0xf0] ss:$8 sps:$4 sm:$0xff]   ;;  %v2531_v48 = vld [vmem:[%s3200_s1 + $0x200] ss:$8 sps:$4 sm:$0xff]  }
  0x16   : > { %2304 = vmatprep.subr.bf16.mxu1 %v2521_v24  ;;  %v2532_v49 = vld [vmem:[%s3200_s1 + $0x100] ss:$8 sps:$4 sm:$0xff]   ;;  %v2537_v20 = vld [vmem:[%s3200_s1 + $0x2b0] ss:$8 sps:$4 sm:$0xff]  }
  0x17   : > { %2497 = vrot.lane.b32.xlu0 %v2496_v12, %s2675_s27  ;;  %2413 = vmatpush3.bf16.msra.mxu0 %v2505_v14  ;;  %v2533_v50 = vld [vmem:[%s3200_s1 + $0x2a0] ss:$8 sps:$4 sm:$0xff]   ;;  %v2538_v23 = vld [vmem:[%s3200_s1 + $0x230] ss:$8 sps:$4 sm:$0xff]  }
  0x18   : > { %2414 = vmatprep.subr.bf16.mxu0 %v2506_v17  ;;  %v2535_v51 = vld [vmem:[%s3200_s1 + $0x3a0] ss:$8 sps:$4 sm:$0xff]   ;;  %v2540_v24 = vld [vmem:[%s3200_s1 + $0x330] ss:$8 sps:$4 sm:$0xff]  }
  0x19   : > { %2305 = vmatpush3.bf16.msra.mxu1 %v2523_v26  ;;  %v186_v54 = vld [vmem:[%s3200_s1 + $0x80] sm:$0x1] }
  0x1a   : > { %2306 = vmatprep.subr.bf16.mxu1 %v2524_v41  ;;  %v187_v55 = vunpack.c.l.bf16 %v186_v54  ;;  %v2536_v19 = vld [vmem:[%s3200_s1 + $0x320] ss:$8 sps:$4 sm:$0xff]   ;;  %v2556_v41 = vld [vmem:[%s3200_s1 + $0x370] ss:$8 sps:$4 sm:$0xff]  }
  0x1b   : > { %159 = vrot.lane.b32.xlu0 %v153_v8, %s2675_s27  ;;  %2415 = vmatpush3.bf16.msra.mxu0 %v2506_v17  ;;  %v2534_v17 = vld [vmem:[%s3200_s1 + $0x220] ss:$8 sps:$4 sm:$0xff]  }
  0x1c   : > { %2416 = vmatprep.subr.bf16.mxu0 %v2507_v22  ;;  %v191_v57 = vrot.slane %v187_v55, %v2827_v56 }
  0x1d   : > { %2307 = vmatpush3.bf16.msra.mxu1 %v2526_v43  ;;  %v2558_v43 = vld [vmem:[%s3200_s1 + $0x280] ss:$8 sps:$4 sm:$0xff]  }
  0x1e   : > { %2308 = vmatprep.subr.bf16.mxu1 %v2527_v44  ;;  %v2559_v44 = vld [vmem:[%s3200_s1 + $0x400] ss:$8 sps:$4 sm:$0xff]  }
  0x1f   : > { %2417 = vmatpush3.bf16.msra.mxu0 %v2507_v22  ;;  %v2539_v22 = vld [vmem:[%s3200_s1 + $0x3b0] ss:$8 sps:$4 sm:$0xff]  }
  0x20   : > { %2418 = vmatprep.subr.bf16.mxu0 %v2508_v25 }
  0x21   : > { %2309 = vmatpush3.bf16.msra.mxu1 %v2529_v46  ;;  %v2561_v46 = vld [vmem:[%s3200_s1 + $0x310] ss:$8 sps:$4 sm:$0xff]  }
  0x22   : > { %2310 = vmatprep.subr.bf16.mxu1 %v2530_v47  ;;  %v2562_v47 = vld [vmem:[%s3200_s1 + $0x290] ss:$8 sps:$4 sm:$0xff]  }
  0x23   : > { %2419 = vmatpush3.bf16.msra.mxu0 %v2508_v25  ;;  %v2541_v25 = vld [vmem:[%s3200_s1 + $0x2c0] ss:$8 sps:$4 sm:$0xff]  }
  0x24   : > { %2424 = vmatprep.subr.bf16.mxu0 %v2510_v27 }
  0x25   : > { %2311 = vmatpush3.bf16.msra.mxu1 %v2532_v49  ;;  %v2564_v49 = vld [vmem:[%s3200_s1 + $0x390] ss:$8 sps:$4 sm:$0xff]  }
  0x26   : > { %2334 = vmatprep.subr.bf16.mxu1 %v2533_v50  ;;  %v2927_v50 = vld [vmem:[%s3200_s1 + $0x420] ss:$8 sps:$4 sm:$0xff]  }
  0x89   : > { %v2498_v28 = vpop.permute.xlu0 %2497 }
  0x8a   : > { %v2500_v29 = vunpack.i.h.bf16 %v2498_v28  ;;  %v2499_v30 = vunpack.i.l.bf16 %v2498_v28  ;;  %v2543_v28 = vld [vmem:[%s3200_s1 + $0x3c0] ss:$8 sps:$4 sm:$0xff]  }
  0x8c   : > { %v165_v31 = vsel %vm164_vm1, %v143_v3, %v2499_v30  ;;  %v166_v32 = vsel %vm164_vm1, %v144_v4, %v2500_v29  ;;  %v2544_v29 = vld [vmem:[%s3200_s1 + $0x340] ss:$8 sps:$4 sm:$0xff]   ;;  %v2545_v30 = vld [vmem:[%s3200_s1 + $0x2d0] ss:$8 sps:$4 sm:$0xff]  }
  0x8d   : > { %v160_v33 = vpop.permute.xlu0 %159  ;;  %v168_v34 = vpack.c.bf16 %v166_v32, %v165_v31  ;;  %v2546_v31 = vld [vmem:[%s3200_s1 + $0x250] ss:$8 sps:$4 sm:$0xff]  }
  0x8e   : > { %v167_v35 = vsel %vm164_vm1, %v145_v5, %v160_v33  ;;  %v2547_v32 = vld [vmem:[%s3200_s1 + $0x3d0] ss:$8 sps:$4 sm:$0xff]  }
  0x8f   : > { %v169_v36 = vpack.c.bf16 %v167_v35, %v167_v35  ;;  %2420 = vmatprep.mubr.bf16.mxu0 %v168_v34  ;;  %v2548_v33 = vld [vmem:[%s3200_s1 + $0x350] ss:$8 sps:$4 sm:$0xff]   ;;  %v2549_v34 = vld [vmem:[%s3200_s1 + $0x2e0] ss:$8 sps:$4 sm:$0xff]  }
  0x90   : > { %v2550_v35 = vld [vmem:[%s3200_s1 + $0x260] ss:$8 sps:$4 sm:$0xff]  }
  0x91   : > { %2421 = vmatmul.mubr.bf16.vlgmr.msra.gmra.mrb[0].mxu0 %v169_v36  ;;  %v2551_v36 = vld [vmem:[%s3200_s1 + $0x3e0] ss:$8 sps:$4 sm:$0xff]  }
  0x92   : > { %2425 = vmatpush3.bf16.msra.mxu0 %v2510_v27  ;;  %v2542_v27 = vld [vmem:[%s3200_s1 + $0x240] ss:$8 sps:$4 sm:$0xff]  }
  0x93   : > { %2426 = vmatprep.subr.bf16.mxu0 %v2513_v37 }
  0x96   : > { %2427 = vmatpush3.bf16.msra.mxu0 %v2513_v37  ;;  %v2552_v37 = vld [vmem:[%s3200_s1 + $0x360] ss:$8 sps:$4 sm:$0xff]  }
  0x97   : > { %2428 = vmatprep.subr.bf16.mxu0 %v2516_v38 }
  0x9a   : > { %2429 = vmatpush3.bf16.msra.mxu0 %v2516_v38  ;;  %v2553_v38 = vld [vmem:[%s3200_s1 + $0x2f0] ss:$8 sps:$4 sm:$0xff]  }
  0x9b   : > { %2430 = vmatprep.subr.bf16.mxu0 %v2519_v39 }
  0x9e   : > { %2431 = vmatpush3.bf16.msra.mxu0 %v2519_v39  ;;  %v2554_v39 = vld [vmem:[%s3200_s1 + $0x270] ss:$8 sps:$4 sm:$0xff]  }
  0x9f   : > { %2432 = vmatprep.subr.bf16.mxu0 %v2522_v40 }
  0xa2   : > { %2433 = vmatpush3.bf16.msra.mxu0 %v2522_v40  ;;  %v2555_v40 = vld [vmem:[%s3200_s1 + $0x3f0] ss:$8 sps:$4 sm:$0xff]  }
  0xa3   : > { %2434 = vmatprep.subr.bf16.mxu0 %v2525_v42 }
  0xa6   : > { %2435 = vmatpush3.bf16.msra.mxu0 %v2525_v42  ;;  %v2557_v42 = vld [vmem:[%s3200_s1 + $0x300] ss:$8 sps:$4 sm:$0xff]  }
  0xa7   : > { %2436 = vmatprep.subr.bf16.mxu0 %v2528_v45 }
  0xaa   : > { %2437 = vmatpush3.bf16.msra.mxu0 %v2528_v45  ;;  %v2560_v45 = vld [vmem:[%s3200_s1 + $0x380] ss:$8 sps:$4 sm:$0xff]  }
  0xab   : > { %2438 = vmatprep.subr.bf16.mxu0 %v2531_v48 }
  0xae   : > { %2439 = vmatpush3.bf16.msra.mxu0 %v2531_v48  ;;  %v2563_v48 = vld [vmem:[%s3200_s1 + $0x410] ss:$8 sps:$4 sm:$0xff]  }
  0xaf   : > { %2362 = vmatprep.subr.bf16.mxu0 %v2535_v51  ;;  %v365_v51 = vld [vmem:[%s3200_s1 + $0x210] sm:$0x1] }
  0xb0   : > { %v366_v52 = vunpack.c.l.bf16 %v365_v51 }
  0xb2   : > { %v370_v55 = vrot.slane %v366_v52, %v2827_v56  ;;  %v2967_v52 = vld [vmem:[%s3200_s1 + $0x4f4] ss:$8 sps:$4 sm:$0xff]  }
 0x164   : > { %v2422_v58 = vpop.f32.mrb[0].mxu0 }
 0x165   : > { %v283_v59 = vadd.f32 %v2422_v58, %v191_v57  ;;  %v274_v60 = vpop.f32.mrb[1].mxu0 }
 0x166   : > { %v275_v61 = vadd.f32 %v274_v60, %v191_v57  ;;  %v2423_v62 = vpop.f32.mrb[2].mxu0 }
 0x167   : > { %v290_v63 = vmax.f32 %v283_v59, 0.0  ;;  %v277_v0 = vpop.f32.mrb[3].mxu0 }
 0x168   : > { %v288_v1 = vmax.f32 %v275_v61, 0.0  ;;  %v278_v2 = vadd.f32 %v277_v0, %v191_v57 }
 0x169   : > { %v306_v4 = vrot.slane %v290_v63, 2  ;;  %v297_v6 = vrot.slane %v290_v63, 1  ;;  %v314_v26 = vpack.c.bf16 %v290_v63, %v290_v63 }
 0x16a   : > { %v289_v3 = vmax.f32 %v278_v2, 0.0  ;;  %v303_v5 = vrot.slane %v288_v1, 2  ;;  %v294_v8 = vrot.slane %v288_v1, 1 }
 0x16b   : > { %v316_v18 = vpack.c.bf16 %v306_v4, %v306_v4  ;;  %v315_v21 = vpack.c.bf16 %v297_v6, %v297_v6 }
 0x16c   : > { %v304_v7 = vrot.slane %v289_v3, 2  ;;  %v295_v9 = vrot.slane %v289_v3, 1  ;;  %v311_v10 = vpack.c.bf16 %v289_v3, %v288_v1 }
 0x16e   : > { %v296_v11 = vsel %vm149_vm0, %v294_v8, %v295_v9  ;;  %v298_v12 = vsel %vm149_vm0, %v295_v9, %v297_v6  ;;  %v305_v13 = vsel %vm302_vm2, %v303_v5, %v304_v7  ;;  %v307_v14 = vsel %vm302_vm2, %v304_v7, %v306_v4 }
 0x16f   : > { %v312_v15 = vpack.c.bf16 %v298_v12, %v296_v11  ;;  %v313_v16 = vpack.c.bf16 %v307_v14, %v305_v13 }
 0x171   : > { %547 = vmatprep.mubr.bf16.mxu1 %v312_v15  ;;  %2440 = vmatprep.mubr.bf16.mxu0 %v313_v16 }
 0x172   : > { %548 = vmatmul.mubr.bf16.vlgmr.msra.gmra.mrb[0].mxu1 %v311_v10  ;;  %2441 = vmatmul.mubr.bf16.vlgmr.msra.gmra.mrb[4].mxu0 %v316_v18 }
 0x173   : > { %555 = vmatprep.mubr.bf16.mxu1 %v315_v21  ;;  %2335 = vmatpush3.bf16.msra.mxu1 %v2534_v17 }
 0x174   : > { %2363 = vmatpush3.bf16.msra.mxu0 %v2536_v19  ;;  %2336 = vmatprep.subr.bf16.mxu1 %v2537_v20 }
 0x175   : > { %2364 = vmatprep.subr.bf16.mxu0 %v2539_v22 }
 0x177   : > { %2337 = vmatpush3.bf16.msra.mxu1 %v2538_v23 }
 0x178   : > { %2365 = vmatpush3.bf16.msra.mxu0 %v2540_v24  ;;  %2338 = vmatprep.subr.bf16.mxu1 %v2541_v25 }
 0x179   : > { %2366 = vmatprep.subr.bf16.mxu0 %v2543_v28 }
 0x17a   : > { %556 = vmatmul.mubr.bf16.gmra.mrb[4].mxu1 %v314_v26 }
 0x17b   : > { %2339 = vmatpush3.bf16.msra.mxu1 %v2542_v27 }
 0x17c   : > { %2367 = vmatpush3.bf16.msra.mxu0 %v2544_v29  ;;  %2340 = vmatprep.subr.bf16.mxu1 %v2545_v30 }
 0x17d   : > { %2368 = vmatprep.subr.bf16.mxu0 %v2547_v32 }
 0x17f   : > { %2341 = vmatpush3.bf16.msra.mxu1 %v2546_v31 }
 0x180   : > { %2369 = vmatpush3.bf16.msra.mxu0 %v2548_v33  ;;  %2342 = vmatprep.subr.bf16.mxu1 %v2549_v34 }
 0x181   : > { %2370 = vmatprep.subr.bf16.mxu0 %v2551_v36 }
 0x183   : > { %2343 = vmatpush3.bf16.msra.mxu1 %v2550_v35 }
 0x184   : > { %2371 = vmatpush3.bf16.msra.mxu0 %v2552_v37  ;;  %2344 = vmatprep.subr.bf16.mxu1 %v2553_v38  ;;  %v2566_v38 = vld [vmem:[%s3200_s1 + $0x430] ss:$8 sps:$4 sm:$0xff]  }
 0x185   : > { %2372 = vmatprep.subr.bf16.mxu0 %v2555_v40 }
 0x187   : > { %2345 = vmatpush3.bf16.msra.mxu1 %v2554_v39 }
 0x188   : > { %2373 = vmatpush3.bf16.msra.mxu0 %v2556_v41  ;;  %2346 = vmatprep.subr.bf16.mxu1 %v2557_v42 }
 0x189   : > { %2374 = vmatprep.subr.bf16.mxu0 %v2559_v44 }
 0x18b   : > { %2347 = vmatpush3.bf16.msra.mxu1 %v2558_v43  ;;  %v2567_v43 = vld [vmem:[%s3200_s1 + $0x440] ss:$8 sps:$4 sm:$0xff]  }
 0x18c   : > { %2375 = vmatpush3.bf16.msra.mxu0 %v2560_v45  ;;  %2348 = vmatprep.subr.bf16.mxu1 %v2561_v46  ;;  %v2568_v46 = vld [vmem:[%s3200_s1 + $0x450] ss:$8 sps:$4 sm:$0xff]  }
 0x18d   : > { %2376 = vmatprep.subr.bf16.mxu0 %v2563_v48  ;;  %v2570_v48 = vld [vmem:[%s3200_s1 + $0x470] ss:$8 sps:$4 sm:$0xff]  }
 0x18f   : > { %2349 = vmatpush3.bf16.msra.mxu1 %v2562_v47  ;;  %v2569_v47 = vld [vmem:[%s3200_s1 + $0x460] ss:$8 sps:$4 sm:$0xff]  }
 0x190   : > { %2377 = vmatpush3.bf16.msra.mxu0 %v2564_v49  ;;  %2444 = vmatprep.subr.bf16.mxu1 %v2927_v50  ;;  %v2571_v49 = vld [vmem:[%s3200_s1 + $0x480] ss:$8 sps:$4 sm:$0xff]  }
 0x245   : > { %v2312_v53 = vpop.f32.mrb[0].mxu1  ;;  %v2442_v54 = vpop.f32.mrb[4].mxu0 }
 0x246   : > { %v2313_v57 = vpop.f32.mrb[1].mxu1  ;;  %v597_v58 = vpop.f32.mrb[5].mxu0 }
 0x247   : > { %v2314_v59 = vadd.f32 %v2313_v57, %v2312_v53  ;;  %v2315_v60 = vpop.f32.mrb[2].mxu1  ;;  %v2443_v61 = vpop.f32.mrb[6].mxu0  ;;  %v2575_v53 = vld [vmem:[%s3200_s1 + $0x4b4] ss:$8 sps:$4 sm:$0xff]   ;;  %v2985_v57 = vld [vmem:[%s3200_s1 + $0x504] ss:$8 sps:$4 sm:$0xff]  }
 0x248   : > { %v2316_v62 = vpop.f32.mrb[3].mxu1  ;;  %v600_v63 = vpop.f32.mrb[7].mxu0  ;;  %1213 = vmatprep.subr.bf16.mxu0 %v2575_v53  ;;  %v2587_v61 = vld [vmem:[%s3200_s1 + $0x4d4] ss:$8 sps:$4 sm:$0xff]  }
 0x249   : > { %v550_v0 = vadd.f32 %v2314_v59, %v370_v55  ;;  %v2317_v1 = vadd.f32 %v2316_v62, %v2315_v60  ;;  %v2993_v59 = vld [vmem:[%s3200_s1 + $0x500] ss:$8 sps:$4 sm:$0xff]   ;;  %v3006_v62 = vld [vmem:[%s3200_s1 + $0x514] ss:$8 sps:$4 sm:$0xff]  }
 0x24a   : > { %v2579_v60 = vld [vmem:[%s3200_s1 + $0x4c0] ss:$8 sps:$4 sm:$0xff]  }
 0x24b   : > { %v598_v2 = vadd.f32 %v597_v58, %v550_v0  ;;  %v553_v3 = vadd.f32 %v2317_v1, %v370_v55  ;;  %v2581_v58 = vld [vmem:[%s3200_s1 + $0x4c4] ss:$8 sps:$4 sm:$0xff]   ;;  %v2585_v0 = vld [vmem:[%s3200_s1 + $0x4d0] ss:$8 sps:$4 sm:$0xff]  }
 0x24c   : > { %v3019_v1 = vld [vmem:[%s3200_s1 + $0x524] ss:$8 sps:$4 sm:$0xff]  }
 0x24d   : > { %v611_v4 = vmax.f32 %v598_v2, 0.0  ;;  %v601_v5 = vadd.f32 %v600_v63, %v553_v3  ;;  %v2318_v6 = vpop.f32.mrb[4].mxu1  ;;  %v3011_v63 = vld [vmem:[%s3200_s1 + $0x510] ss:$8 sps:$4 sm:$0xff]   ;;  %v2593_v2 = vld [vmem:[%s3200_s1 + $0x4e4] ss:$8 sps:$4 sm:$0xff]  }
 0x24e   : > { %v2319_v7 = vpop.f32.mrb[5].mxu1  ;;  %v2676_v3 = vmov 0  }
 0x24f   : > { %v612_v8 = vmax.f32 %v601_v5, 0.0  ;;  %v2320_v9 = vadd.f32 %v2319_v7, %v2318_v6  ;;  %v2321_v10 = vpop.f32.mrb[6].mxu1  ;;  %v617_v12 = vrot.slane %v611_v4, 1  ;;  %v634_v13 = vrot.slane %v611_v4, 3  ;;  %v2591_v5 = vld [vmem:[%s3200_s1 + $0x4e0] ss:$8 sps:$4 sm:$0xff]  }
 0x250   : > { %v2322_v11 = vpop.f32.mrb[7].mxu1  ;;  %v625_v18 = vrot.slane %v611_v4, 2  ;;  %v643_v20 = vrot.slane %v611_v4, 4  ;;  %v741_v6 = vld [vmem:[%s3200_s1 + $0x4a0] sm:$0x1] }
 0x251   : > { %v558_v14 = vadd.f32 %v2320_v9, %v370_v55  ;;  %v618_v15 = vrot.slane %v612_v8, 1  ;;  %v635_v16 = vrot.slane %v612_v8, 3  ;;  %v651_v17 = vpack.c.bf16 %v612_v8, %v611_v4  ;;  %v2573_v55 = vld [vmem:[%s3200_s1 + $0x4b0] ss:$8 sps:$4 sm:$0xff]   ;;  %v3031_v4 = vld [vmem:[%s3200_s1 + $0x520] ss:$8 sps:$4 sm:$0xff]  }
 0x252   : > { %v626_v19 = vrot.slane %v612_v8, 2  ;;  %v644_v21 = vrot.slane %v612_v8, 4  ;;  %v742_v7 = vunpack.c.l.bf16 %v741_v6 }
 0x253   : > { %v606_v22 = vadd.f32 %v2442_v54, %v558_v14  ;;  %v619_v23 = vsel %vm149_vm0, %v617_v12, %v618_v15  ;;  %v636_v24 = vsel %vm633_vm3, %v634_v13, %v635_v16  ;;  %v2975_v54 = vld [vmem:[%s3200_s1 + $0x4f0] ss:$8 sps:$4 sm:$0xff]  }
 0x254   : > { %v627_v25 = vsel %vm302_vm2, %v625_v18, %v626_v19  ;;  %v645_v26 = vsel %vm642_vm4, %v643_v20, %v644_v21  ;;  %v746_v10 = vrot.slane %v742_v7, %v2827_v56 }
 0x255   : > { %v613_v27 = vmax.f32 %v606_v22, 0.0 }
 0x257   : > { %v620_v28 = vrot.slane %v613_v27, 1  ;;  %v637_v29 = vrot.slane %v613_v27, 3  ;;  %v628_v30 = vrot.slane %v613_v27, 2  ;;  %v646_v31 = vrot.slane %v613_v27, 4 }
 0x258   : > { %v656_v44 = vpack.c.bf16 %v613_v27, %v613_v27 }
 0x259   : > { %v621_v32 = vsel %vm149_vm0, %v618_v15, %v620_v28  ;;  %v638_v33 = vsel %vm633_vm3, %v635_v16, %v637_v29  ;;  %v629_v34 = vsel %vm302_vm2, %v626_v19, %v628_v30  ;;  %v647_v39 = vsel %vm642_vm4, %v644_v21, %v646_v31 }
 0x25a   : > { %v652_v35 = vpack.c.bf16 %v621_v32, %v619_v23  ;;  %v654_v36 = vpack.c.bf16 %v638_v33, %v636_v24  ;;  %v653_v37 = vpack.c.bf16 %v629_v34, %v627_v25  ;;  %v657_v40 = vpack.c.bf16 %v620_v28, %v620_v28 }
 0x25b   : > { %v655_v41 = vpack.c.bf16 %v647_v39, %v645_v26  ;;  %v659_v42 = vpack.c.bf16 %v637_v29, %v637_v29  ;;  %v658_v45 = vpack.c.bf16 %v628_v30, %v628_v30  ;;  %v660_v51 = vpack.c.bf16 %v646_v31, %v646_v31 }
 0x25c   : > { %1019 = vmatprep.mubr.bf16.mxu1 %v652_v35  ;;  %1067 = vmatprep.mubr.bf16.mxu0 %v654_v36 }
 0x25d   : > { %1020 = vmatmul.mubr.bf16.vlgmr.msra.gmra.mrb[8].mxu1 %v651_v17  ;;  %1068 = vmatmul.mubr.bf16.vlgmr.msra.gmra.mrb[8].mxu0 %v653_v37 }
 0x25e   : > { %2445 = vmatpush3.bf16.msra.mxu1 %v2927_v50  ;;  %1027 = vmatprep.mubr.bf16.mxu1 %v657_v40  ;;  %v2572_v50 = vld [vmem:[%s3200_s1 + $0x490] ss:$8 sps:$4 sm:$0xff]  }
 0x25f   : > { %1075 = vmatprep.mubr.bf16.mxu0 %v659_v42  ;;  %2446 = vmatprep.subr.bf16.mxu1 %v2566_v38 }
 0x260   : > { %1214 = vmatpush1.bf16.msra.mxu0 %v2573_v55 }
 0x261   : > { %1215 = vmatprep.subr.bf16.mxu0 %v2581_v58 }
 0x262   : > { %2447 = vmatpush3.bf16.msra.mxu1 %v2566_v38 }
 0x263   : > { %2448 = vmatprep.subr.bf16.mxu1 %v2567_v43 }
 0x264   : > { %1216 = vmatpush1.bf16.msra.mxu0 %v2579_v60 }
 0x265   : > { %1028 = vmatmul.mubr.bf16.gmra.mrb[12].mxu1 %v656_v44  ;;  %1076 = vmatmul.mubr.bf16.gmra.mrb[12].mxu0 %v658_v45 }
 0x266   : > { %2449 = vmatpush3.bf16.msra.mxu1 %v2567_v43  ;;  %2460 = vmatprep.mubr.bf16.mxu1 %v655_v41 }
 0x267   : > { %2450 = vmatprep.subr.bf16.mxu1 %v2568_v46  ;;  %1217 = vmatprep.subr.bf16.mxu0 %v2587_v61 }
 0x268   : > { %1245 = vmatprep.mubr.bf16.mxu0 %v2676_v3  ;;  %1218 = vmatpush1.bf16.msra.mxu0 %v2585_v0 }
 0x269   : > { %1219 = vmatprep.subr.bf16.mxu0 %v2593_v2 }
 0x26a   : > { %2451 = vmatpush3.bf16.msra.mxu1 %v2568_v46 }
 0x26b   : > { %2452 = vmatprep.subr.bf16.mxu1 %v2569_v47 }
 0x26c   : > { %1220 = vmatpush1.bf16.msra.mxu0 %v2591_v5 }
 0x26d   : > { %1370 = vmatprep.subr.bf16.mxu0 %v2967_v52 }
 0x26e   : > { %2453 = vmatpush3.bf16.msra.mxu1 %v2569_v47 }
 0x26f   : > { %2454 = vmatprep.subr.bf16.mxu1 %v2570_v48 }
 0x272   : > { %2455 = vmatpush3.bf16.msra.mxu1 %v2570_v48 }
 0x273   : > { %2456 = vmatprep.subr.bf16.mxu1 %v2571_v49 }
 0x276   : > { %2457 = vmatpush3.bf16.msra.mxu1 %v2571_v49  ;;  %v1159_v49 = vld [vmem:[%s3200_s1 + $0x530] sm:$0x11] }
 0x277   : > { %2458 = vmatprep.subr.bf16.mxu1 %v2572_v50  ;;  %v1160_v5 = vunpack.c.l.bf16 %v1159_v49 }
 0x279   : > { %v1165_v6 = vrot.slane %v1160_v5, %v2827_v56 }
 0x27a   : > { %2459 = vmatpush3.bf16.msra.mxu1 %v2572_v50  ;;  %v1161_v50 = vunpack.c.h.bf16 %v1159_v49 }
 0x27b   : > { %1297 = vmatprep.subr.bf16.mxu1 %v2967_v52 }
 0x27d   : > { %2461 = vmatmul.mubr.bf16.vlgmr.msra.gmra.mrb[16].mxu1 %v660_v51  ;;  %v1169_v51 = vrot.slane %v1161_v50, %v2827_v56 }
 0x27e   : > { %1298 = vmatpush1.bf16.msra.mxu1 %v2975_v54  ;;  %1329 = vmatprep.mubr.bf16.mxu1 %v2676_v3 }
 0x27f   : > { %1299 = vmatprep.subr.bf16.mxu1 %v2985_v57 }
 0x282   : > { %1300 = vmatpush1.bf16.msra.mxu1 %v2993_v59 }
 0x283   : > { %1301 = vmatprep.subr.bf16.mxu1 %v3006_v62 }
 0x286   : > { %1302 = vmatpush1.bf16.msra.mxu1 %v3011_v63 }
 0x287   : > { %1303 = vmatprep.subr.bf16.mxu1 %v3019_v1 }
 0x28a   : > { %1304 = vmatpush1.bf16.msra.mxu1 %v3031_v4 }
 0x28b   : > { %1455 = vmatprep.subr.bf16.mxu1 %v2967_v52 }
 0x28d   : > { %1330 = vmatmul.mubr.bf16.vlgmr.msra.gmra.mrb[20].mxu1 %v2676_v3 }
 0x28e   : > { %1456 = vmatpush1.bf16.msra.mxu1 %v2975_v54  ;;  %1487 = vmatprep.mubr.bf16.mxu1 %v2676_v3 }
 0x28f   : > { %1457 = vmatprep.subr.bf16.mxu1 %v2985_v57 }
 0x292   : > { %1458 = vmatpush1.bf16.msra.mxu1 %v2993_v59 }
 0x293   : > { %1459 = vmatprep.subr.bf16.mxu1 %v3006_v62 }
 0x296   : > { %1460 = vmatpush1.bf16.msra.mxu1 %v3011_v63 }
 0x297   : > { %1461 = vmatprep.subr.bf16.mxu1 %v3019_v1 }
 0x29a   : > { %1462 = vmatpush1.bf16.msra.mxu1 %v3031_v4 }
 0x29b   : > { %1625 = vmatprep.subr.bf16.mxu1 %v2967_v52 }
 0x330   : > { %v2350_v8 = vpop.f32.mrb[8].mxu1  ;;  %v2378_v9 = vpop.f32.mrb[8].mxu0 }
 0x331   : > { %v2351_v11 = vpop.f32.mrb[9].mxu1  ;;  %v2379_v12 = vpop.f32.mrb[9].mxu0 }
 0x332   : > { %v2352_v13 = vadd.f32 %v2351_v11, %v2350_v8  ;;  %v2380_v14 = vadd.f32 %v2379_v12, %v2378_v9  ;;  %v2353_v15 = vpop.f32.mrb[10].mxu1  ;;  %v2381_v16 = vpop.f32.mrb[10].mxu0 }
 0x333   : > { %v2354_v17 = vpop.f32.mrb[11].mxu1  ;;  %v2382_v18 = vpop.f32.mrb[11].mxu0 }
 0x334   : > { %v1022_v19 = vadd.f32 %v2352_v13, %v746_v10  ;;  %v2355_v20 = vadd.f32 %v2354_v17, %v2353_v15  ;;  %v2383_v21 = vadd.f32 %v2382_v18, %v2381_v16 }
 0x336   : > { %v1025_v22 = vadd.f32 %v2355_v20, %v746_v10  ;;  %v1070_v23 = vadd.f32 %v2380_v14, %v1022_v19 }
 0x338   : > { %v2356_v24 = vpop.f32.mrb[12].mxu1  ;;  %v2384_v25 = vpop.f32.mrb[12].mxu0  ;;  %v1073_v26 = vadd.f32 %v2383_v21, %v1025_v22 }
 0x339   : > { %v2357_v27 = vpop.f32.mrb[13].mxu1  ;;  %v2385_v28 = vpop.f32.mrb[13].mxu0 }
 0x33a   : > { %v2359_v29 = vpop.f32.mrb[14].mxu1  ;;  %v2387_v30 = vpop.f32.mrb[14].mxu0 }
 0x33b   : > { %v2360_v31 = vpop.f32.mrb[15].mxu1  ;;  %v2388_v32 = vpop.f32.mrb[15].mxu0 }
 0x350   : > { %v2462_v33 = vpop.f32.mrb[16].mxu1 }
 0x351   : > { %v1117_v34 = vpop.f32.mrb[17].mxu1 }
 0x352   : > { %v1118_v35 = vadd.f32 %v1117_v34, %v1070_v23  ;;  %v2463_v36 = vpop.f32.mrb[18].mxu1 }
 0x353   : > { %v1120_v37 = vpop.f32.mrb[19].mxu1 }
 0x354   : > { %v1131_v38 = vmax.f32 %v1118_v35, 0.0  ;;  %v1121_v39 = vadd.f32 %v1120_v37, %v1073_v26 }
 0x356   : > { %1134 = vst.msk [vmem:[#allocation2] sm:$0xff] %vm164_vm1, %v1131_v38  ;;  %v1132_v40 = vmax.f32 %v1121_v39, 0.0 }
 0x358   : > { %1135 = vst.msk [vmem:[#allocation2 + $0x8] sm:$0xff] %vm164_vm1, %v1132_v40 }
 0x35f   : > { %v1138_v41 = vld [vmem:[#allocation2] ss:$2 sm:$0xff]  ;;  %v1140_v42 = vld [vmem:[#allocation2 + $0x1] ss:$2 sm:$0xff] }
 0x360   : > { %v1141_v43 = vmax.f32 %v1138_v41, %v1140_v42  ;;  %v1331_v45 = vpop.f32.mrb[20].mxu1 }
 0x361   : > { %v1333_v46 = vpop.f32.mrb[21].mxu1 }
 0x362   : > { %v1150_v44 = vpack.c.bf16 %v1141_v43, %v1141_v43  ;;  %v1335_v47 = vpop.f32.mrb[22].mxu1 }
 0x363   : > { %v1336_v48 = vpop.f32.mrb[23].mxu1 }
 0x364   : > { %2265 = vmatmul.mubr.msk.bf16.vlgmr.msra.gmra.mrb[16].mxu0 %vm164_vm1, %v1150_v44 }
 0x365   : > { %1371 = vmatpush1.bf16.msra.mxu0 %v2975_v54  ;;  %1402 = vmatprep.mubr.bf16.mxu0 %v2676_v3 }
 0x366   : > { %1372 = vmatprep.subr.bf16.mxu0 %v2985_v57 }
 0x369   : > { %1373 = vmatpush1.bf16.msra.mxu0 %v2993_v59 }
 0x36a   : > { %1374 = vmatprep.subr.bf16.mxu0 %v3006_v62 }
 0x36d   : > { %1375 = vmatpush1.bf16.msra.mxu0 %v3011_v63 }
 0x36e   : > { %1376 = vmatprep.subr.bf16.mxu0 %v3019_v1 }
 0x371   : > { %1377 = vmatpush1.bf16.msra.mxu0 %v3031_v4 }
 0x372   : > { %1539 = vmatprep.subr.bf16.mxu0 %v2967_v52 }
 0x437   : > { %v1247_v53 = vpop.f32.mrb[16].mxu0 }
 0x438   : > { %v1249_v55 = vpop.f32.mrb[17].mxu0  ;;  %v3075_v7 = vadd.f32 %v1247_v53, %v1165_v6 }
 0x439   : > { %v3070_v58 = vadd.f32 %v1249_v55, %v1169_v51  ;;  %v1251_v60 = vpop.f32.mrb[18].mxu0 }
 0x43a   : > { %v1252_v61 = vpop.f32.mrb[19].mxu0  ;;  %v1338_v8 = vadd.f32 %v1331_v45, %v3075_v7 }
 0x43b   : > { %v1339_v0 = vadd.f32 %v1333_v46, %v3070_v58 }
 0x43c   : > { %v1340_v9 = vmul.f32 0.5, %v1338_v8 }
 0x43d   : > { %2597 = vtanh.f32 %v1339_v0  ;;  %v1341_v19 = vmul.f32 0.5, %v1339_v0 }
 0x43e   : > { %2599 = vtanh.f32 %v1340_v9 }
 0x447   : > { %v2598_v2 = vpop.eup %2597 }
 0x448   : > { %1351 = vrot.lane.b32.xlu1 %v2598_v2, %s2675_s27  ;;  %v2600_v10 = vpop.eup %2599 }
 0x449   : > { %v1344_v11 = vmul.f32 0.5, %v2600_v10 }
 0x44b   : > { %v1346_v12 = vadd.f32 0.5, %v1344_v11 }
 0x44d   : > { %v1349_v15 = vmul.f32 0.0, %v1346_v12 }
 0x4ba   : > { %v1352_v13 = vpop.permute.xlu1 %1351 }
 0x4bb   : > { %v1354_v14 = vmul.f32 %v1352_v13, %v1346_v12 }
 0x4bd   : > { %1356 = vrot.lane.b32.xlu1 %v1354_v14, %s2675_s27 }
 0x52f   : > { %v1357_v16 = vpop.permute.xlu1 %1356 }
 0x530   : > { %v1359_v17 = vadd.f32 %v1357_v16, %v1349_v15 }
 0x532   : > { %2601 = vtanh.f32 %v1359_v17  ;;  %v1429_v41 = vrot.slane %v1359_v17, 7 }
 0x533   : > { %2603 = vtanh.f32 %v1341_v19 }
 0x53c   : > { %v2602_v18 = vpop.eup %2601 }
 0x53d   : > { %1362 = vrot.lane.b32.xlu0 %v2602_v18, %s2675_s27  ;;  %v2604_v20 = vpop.eup %2603 }
 0x53e   : > { %v1345_v21 = vmul.f32 0.5, %v2604_v20 }
 0x540   : > { %v1347_v22 = vadd.f32 0.5, %v1345_v21 }
 0x5af   : > { %v1363_v23 = vpop.permute.xlu0 %1362 }
 0x5b0   : > { %v1365_v24 = vmul.f32 %v1363_v23, %v1347_v22 }
 0x5b2   : > { %v1366_v25 = vpack.c.bf16 %v1365_v24, %v1365_v24 }
 0x5b4   : > { %2274 = vmatmul.mubr.msk.bf16.vlgmr.msra.gmra.mrb[20].mxu0 %vm164_vm1, %v1366_v25 }
 0x5b5   : > { %1540 = vmatpush1.bf16.msra.mxu0 %v2975_v54  ;;  %1571 = vmatprep.mubr.bf16.mxu0 %v2676_v3 }
 0x5b6   : > { %1541 = vmatprep.subr.bf16.mxu0 %v2985_v57 }
 0x5b9   : > { %1542 = vmatpush1.bf16.msra.mxu0 %v2993_v59 }
 0x5ba   : > { %1543 = vmatprep.subr.bf16.mxu0 %v3006_v62 }
 0x5bd   : > { %1544 = vmatpush1.bf16.msra.mxu0 %v3011_v63 }
 0x5be   : > { %1545 = vmatprep.subr.bf16.mxu0 %v3019_v1 }
 0x5c1   : > { %1546 = vmatpush1.bf16.msra.mxu0 %v3031_v4 }
 0x5c2   : > { %1709 = vmatprep.subr.bf16.mxu0 %v2967_v52 }
 0x687   : > { %v1404_v26 = vpop.f32.mrb[20].mxu0 }
 0x688   : > { %v1406_v27 = vpop.f32.mrb[21].mxu0  ;;  %v1413_v33 = vrot.slane %v1404_v26, 7 }
 0x689   : > { %v1414_v28 = vrot.slane %v1406_v27, 7  ;;  %v1408_v29 = vpop.f32.mrb[22].mxu0 }
 0x68a   : > { %v1409_v30 = vpop.f32.mrb[23].mxu0  ;;  %v1417_v34 = vadd.f32 %v1413_v33, %v3075_v7 }
 0x68b   : > { %v1418_v31 = vadd.f32 %v1414_v28, %v3070_v58 }
 0x68c   : > { %v1419_v35 = vmul.f32 0.5, %v1417_v34 }
 0x68d   : > { %2605 = vtanh.f32 %v1418_v31  ;;  %v1420_v46 = vmul.f32 0.5, %v1418_v31 }
 0x68e   : > { %2607 = vtanh.f32 %v1419_v35 }
 0x697   : > { %v2606_v32 = vpop.eup %2605 }
 0x698   : > { %1433 = vrot.lane.b32.xlu1 %v2606_v32, %s2675_s27  ;;  %v2608_v36 = vpop.eup %2607 }
 0x699   : > { %v1423_v37 = vmul.f32 0.5, %v2608_v36 }
 0x69b   : > { %v1425_v38 = vadd.f32 0.5, %v1423_v37 }
 0x69d   : > { %v1431_v42 = vmul.f32 %v1429_v41, %v1425_v38 }
 0x70a   : > { %v1434_v39 = vpop.permute.xlu1 %1433 }
 0x70b   : > { %v1436_v40 = vmul.f32 %v1434_v39, %v1425_v38 }
 0x70d   : > { %1438 = vrot.lane.b32.xlu0 %v1436_v40, %s2675_s27 }
 0x77f   : > { %v1439_v43 = vpop.permute.xlu0 %1438 }
 0x780   : > { %v1441_v44 = vadd.f32 %v1439_v43, %v1431_v42 }
 0x782   : > { %2609 = vtanh.f32 %v1441_v44  ;;  %v1514_v17 = vrot.slane %v1441_v44, 7 }
 0x783   : > { %2611 = vtanh.f32 %v1420_v46 }
 0x78c   : > { %v2610_v45 = vpop.eup %2609 }
 0x78d   : > { %1444 = vrot.lane.b32.xlu1 %v2610_v45, %s2675_s27  ;;  %v2612_v47 = vpop.eup %2611 }
 0x78e   : > { %v1424_v48 = vmul.f32 0.5, %v2612_v47 }
 0x790   : > { %v1426_v49 = vadd.f32 0.5, %v1424_v48 }
 0x7ff   : > { %v1445_v50 = vpop.permute.xlu1 %1444 }
 0x800   : > { %v1447_v51 = vmul.f32 %v1445_v50, %v1426_v49 }
 0x802   : > { %v1448_v53 = vpack.c.bf16 %v1447_v51, %v1447_v51 }
 0x804   : > { %v1450_v55 = vshrl.u32 %v1448_v53, 16 }
 0x806   : > { %2275 = vmatmul.mubr.msk.bf16.vlgmr.msra.gmra.mrb[24].mxu1 %vm164_vm1, %v1450_v55 }
 0x807   : > { %1626 = vmatpush1.bf16.msra.mxu1 %v2975_v54  ;;  %1657 = vmatprep.mubr.bf16.mxu1 %v2676_v3 }
 0x808   : > { %1627 = vmatprep.subr.bf16.mxu1 %v2985_v57 }
 0x80b   : > { %1628 = vmatpush1.bf16.msra.mxu1 %v2993_v59 }
 0x80c   : > { %1629 = vmatprep.subr.bf16.mxu1 %v3006_v62 }
 0x80f   : > { %1630 = vmatpush1.bf16.msra.mxu1 %v3011_v63 }
 0x810   : > { %1631 = vmatprep.subr.bf16.mxu1 %v3019_v1 }
 0x813   : > { %1632 = vmatpush1.bf16.msra.mxu1 %v3031_v4 }
 0x814   : > { %1795 = vmatprep.subr.bf16.mxu1 %v2967_v52 }
 0x8d9   : > { %v1489_v60 = vpop.f32.mrb[24].mxu1 }
 0x8da   : > { %v1491_v61 = vpop.f32.mrb[25].mxu1  ;;  %v1498_v9 = vrot.slane %v1489_v60, 6 }
 0x8db   : > { %v1499_v0 = vrot.slane %v1491_v61, 6  ;;  %v1493_v2 = vpop.f32.mrb[26].mxu1 }
 0x8dc   : > { %v1494_v5 = vpop.f32.mrb[27].mxu1  ;;  %v1502_v10 = vadd.f32 %v1498_v9, %v3075_v7 }
 0x8dd   : > { %v1503_v6 = vadd.f32 %v1499_v0, %v3070_v58 }
 0x8de   : > { %v1504_v11 = vmul.f32 0.5, %v1502_v10 }
 0x8df   : > { %2613 = vtanh.f32 %v1503_v6  ;;  %v1505_v22 = vmul.f32 0.5, %v1503_v6 }
 0x8e0   : > { %2615 = vtanh.f32 %v1504_v11 }
 0x8e9   : > { %v2614_v8 = vpop.eup %2613 }
 0x8ea   : > { %1518 = vrot.lane.b32.xlu0 %v2614_v8, %s2675_s27  ;;  %v2616_v12 = vpop.eup %2615 }
 0x8eb   : > { %v1508_v13 = vmul.f32 0.5, %v2616_v12 }
 0x8ed   : > { %v1510_v14 = vadd.f32 0.5, %v1508_v13 }
 0x8ef   : > { %v1516_v18 = vmul.f32 %v1514_v17, %v1510_v14 }
 0x95c   : > { %v1519_v15 = vpop.permute.xlu0 %1518 }
 0x95d   : > { %v1521_v16 = vmul.f32 %v1519_v15, %v1510_v14 }
 0x95f   : > { %1523 = vrot.lane.b32.xlu1 %v1521_v16, %s2675_s27 }
 0x9d1   : > { %v1524_v19 = vpop.permute.xlu1 %1523 }
 0x9d2   : > { %v1526_v20 = vadd.f32 %v1524_v19, %v1516_v18 }
 0x9d4   : > { %2617 = vtanh.f32 %v1526_v20  ;;  %v1598_v44 = vrot.slane %v1526_v20, 7 }
 0x9d5   : > { %2619 = vtanh.f32 %v1505_v22 }
 0x9de   : > { %v2618_v21 = vpop.eup %2617 }
 0x9df   : > { %1529 = vrot.lane.b32.xlu0 %v2618_v21, %s2675_s27  ;;  %v2620_v23 = vpop.eup %2619 }
 0x9e0   : > { %v1509_v24 = vmul.f32 0.5, %v2620_v23 }
 0x9e2   : > { %v1511_v25 = vadd.f32 0.5, %v1509_v24 }
 0xa51   : > { %v1530_v26 = vpop.permute.xlu0 %1529 }
 0xa52   : > { %v1532_v27 = vmul.f32 %v1530_v26, %v1511_v25 }
 0xa54   : > { %v1533_v28 = vpack.c.bf16 %v1532_v27, %v1532_v27 }
 0xa56   : > { %v1535_v29 = vrot.slane %v1533_v28, 1 }
 0xa58   : > { %2276 = vmatmul.mubr.msk.bf16.vlgmr.msra.gmra.mrb[24].mxu0 %vm164_vm1, %v1535_v29 }
 0xa59   : > { %1710 = vmatpush1.bf16.msra.mxu0 %v2975_v54  ;;  %1741 = vmatprep.mubr.bf16.mxu0 %v2676_v3 }
 0xa5a   : > { %1711 = vmatprep.subr.bf16.mxu0 %v2985_v57 }
 0xa5d   : > { %1712 = vmatpush1.bf16.msra.mxu0 %v2993_v59 }
 0xa5e   : > { %1713 = vmatprep.subr.bf16.mxu0 %v3006_v62 }
 0xa61   : > { %1714 = vmatpush1.bf16.msra.mxu0 %v3011_v63 }
 0xa62   : > { %1715 = vmatprep.subr.bf16.mxu0 %v3019_v1 }
 0xa65   : > { %1716 = vmatpush1.bf16.msra.mxu0 %v3031_v4 }
 0xa66   : > { %1879 = vmatprep.subr.bf16.mxu0 %v2967_v52 }
 0xb2b   : > { %v1573_v30 = vpop.f32.mrb[24].mxu0 }
 0xb2c   : > { %v1575_v31 = vpop.f32.mrb[25].mxu0  ;;  %v1582_v37 = vrot.slane %v1573_v30, 5 }
 0xb2d   : > { %v1583_v32 = vrot.slane %v1575_v31, 5  ;;  %v1577_v33 = vpop.f32.mrb[26].mxu0 }
 0xb2e   : > { %v1578_v34 = vpop.f32.mrb[27].mxu0  ;;  %v1586_v38 = vadd.f32 %v1582_v37, %v3075_v7 }
 0xb2f   : > { %v1587_v35 = vadd.f32 %v1583_v32, %v3070_v58 }
 0xb30   : > { %v1588_v39 = vmul.f32 0.5, %v1586_v38 }
 0xb31   : > { %2621 = vtanh.f32 %v1587_v35  ;;  %v1589_v49 = vmul.f32 0.5, %v1587_v35 }
 0xb32   : > { %2623 = vtanh.f32 %v1588_v39 }
 0xb3b   : > { %v2622_v36 = vpop.eup %2621 }
 0xb3c   : > { %1602 = vrot.lane.b32.xlu1 %v2622_v36, %s2675_s27  ;;  %v2624_v40 = vpop.eup %2623 }
 0xb3d   : > { %v1592_v41 = vmul.f32 0.5, %v2624_v40 }
 0xb3f   : > { %v1594_v42 = vadd.f32 0.5, %v1592_v41 }
 0xb41   : > { %v1600_v45 = vmul.f32 %v1598_v44, %v1594_v42 }
 0xbae   : > { %v1603_v52 = vpop.permute.xlu1 %1602 }
 0xbaf   : > { %v1605_v43 = vmul.f32 %v1603_v52, %v1594_v42 }
 0xbb1   : > { %1607 = vrot.lane.b32.xlu0 %v1605_v43, %s2675_s27 }
 0xc23   : > { %v1608_v46 = vpop.permute.xlu0 %1607 }
 0xc24   : > { %v1610_v47 = vadd.f32 %v1608_v46, %v1600_v45 }
 0xc26   : > { %2625 = vtanh.f32 %v1610_v47  ;;  %v1684_v21 = vrot.slane %v1610_v47, 7 }
 0xc27   : > { %2627 = vtanh.f32 %v1589_v49 }
 0xc30   : > { %v2626_v48 = vpop.eup %2625 }
 0xc31   : > { %1613 = vrot.lane.b32.xlu1 %v2626_v48, %s2675_s27  ;;  %v2628_v50 = vpop.eup %2627 }
 0xc32   : > { %v1593_v51 = vmul.f32 0.5, %v2628_v50 }
 0xc34   : > { %v1595_v53 = vadd.f32 0.5, %v1593_v51 }
 0xca3   : > { %v1614_v55 = vpop.permute.xlu1 %1613 }
 0xca4   : > { %v1616_v60 = vmul.f32 %v1614_v55, %v1595_v53 }
 0xca6   : > { %v1617_v61 = vpack.c.bf16 %v1616_v60, %v1616_v60 }
 0xca8   : > { %v1619_v0 = vshrl.u32 %v1617_v61, 16 }
 0xcaa   : > { %v1621_v2 = vrot.slane %v1619_v0, 1 }
 0xcac   : > { %2277 = vmatmul.mubr.msk.bf16.vlgmr.msra.gmra.mrb[28].mxu1 %vm164_vm1, %v1621_v2 }
 0xcad   : > { %1796 = vmatpush1.bf16.msra.mxu1 %v2975_v54  ;;  %1827 = vmatprep.mubr.bf16.mxu1 %v2676_v3 }
 0xcae   : > { %1797 = vmatprep.subr.bf16.mxu1 %v2985_v57 }
 0xcb1   : > { %1798 = vmatpush1.bf16.msra.mxu1 %v2993_v59 }
 0xcb2   : > { %1799 = vmatprep.subr.bf16.mxu1 %v3006_v62 }
 0xcb5   : > { %1800 = vmatpush1.bf16.msra.mxu1 %v3011_v63 }
 0xcb6   : > { %1801 = vmatprep.subr.bf16.mxu1 %v3019_v1 }
 0xcb9   : > { %1802 = vmatpush1.bf16.msra.mxu1 %v3031_v4 }
 0xd7f   : > { %v1659_v5 = vpop.f32.mrb[28].mxu1 }
 0xd80   : > { %v1661_v6 = vpop.f32.mrb[29].mxu1  ;;  %v1668_v13 = vrot.slane %v1659_v5, 4 }
 0xd81   : > { %v1669_v8 = vrot.slane %v1661_v6, 4  ;;  %v1663_v9 = vpop.f32.mrb[30].mxu1 }
 0xd82   : > { %v1664_v10 = vpop.f32.mrb[31].mxu1  ;;  %v1672_v14 = vadd.f32 %v1668_v13, %v3075_v7 }
 0xd83   : > { %v1673_v11 = vadd.f32 %v1669_v8, %v3070_v58 }
 0xd84   : > { %v1674_v15 = vmul.f32 0.5, %v1672_v14 }
 0xd85   : > { %2629 = vtanh.f32 %v1673_v11  ;;  %v1675_v26 = vmul.f32 0.5, %v1673_v11 }
 0xd86   : > { %2631 = vtanh.f32 %v1674_v15 }
 0xd8f   : > { %v2630_v12 = vpop.eup %2629 }
 0xd90   : > { %1688 = vrot.lane.b32.xlu0 %v2630_v12, %s2675_s27  ;;  %v2632_v16 = vpop.eup %2631 }
 0xd91   : > { %v1678_v17 = vmul.f32 0.5, %v2632_v16 }
 0xd93   : > { %v1680_v18 = vadd.f32 0.5, %v1678_v17 }
 0xd95   : > { %v1686_v22 = vmul.f32 %v1684_v21, %v1680_v18 }
 0xe02   : > { %v1689_v19 = vpop.permute.xlu0 %1688 }
 0xe03   : > { %v1691_v20 = vmul.f32 %v1689_v19, %v1680_v18 }
 0xe05   : > { %1693 = vrot.lane.b32.xlu1 %v1691_v20, %s2675_s27 }
 0xe77   : > { %v1694_v23 = vpop.permute.xlu1 %1693 }
 0xe78   : > { %v1696_v24 = vadd.f32 %v1694_v23, %v1686_v22 }
 0xe7a   : > { %2633 = vtanh.f32 %v1696_v24  ;;  %v1768_v41 = vrot.slane %v1696_v24, 7 }
 0xe7b   : > { %2635 = vtanh.f32 %v1675_v26 }
 0xe84   : > { %v2634_v25 = vpop.eup %2633 }
 0xe85   : > { %1699 = vrot.lane.b32.xlu0 %v2634_v25, %s2675_s27  ;;  %v2636_v27 = vpop.eup %2635 }
 0xe86   : > { %v1679_v28 = vmul.f32 0.5, %v2636_v27 }
 0xe88   : > { %v1681_v29 = vadd.f32 0.5, %v1679_v28 }
 0xef7   : > { %v1700_v30 = vpop.permute.xlu0 %1699 }
 0xef8   : > { %v1702_v31 = vmul.f32 %v1700_v30, %v1681_v29 }
 0xefa   : > { %v1703_v32 = vpack.c.bf16 %v1702_v31, %v1702_v31 }
 0xefc   : > { %v1705_v33 = vrot.slane %v1703_v32, 2 }
 0xefe   : > { %2278 = vmatmul.mubr.msk.bf16.vlgmr.msra.gmra.mrb[28].mxu0 %vm164_vm1, %v1705_v33 }
 0xeff   : > { %1880 = vmatpush1.bf16.msra.mxu0 %v2975_v54  ;;  %1911 = vmatprep.mubr.bf16.mxu0 %v2676_v3 }
 0xf00   : > { %1881 = vmatprep.subr.bf16.mxu0 %v2985_v57 }
 0xf03   : > { %1882 = vmatpush1.bf16.msra.mxu0 %v2993_v59 }
 0xf04   : > { %1883 = vmatprep.subr.bf16.mxu0 %v3006_v62 }
 0xf07   : > { %1884 = vmatpush1.bf16.msra.mxu0 %v3011_v63 }
 0xf08   : > { %1885 = vmatprep.subr.bf16.mxu0 %v3019_v1 }
 0xf0b   : > { %1886 = vmatpush1.bf16.msra.mxu0 %v3031_v4 }
 0xfd1   : > { %v1743_v34 = vpop.f32.mrb[28].mxu0 }
 0xfd2   : > { %v1745_v35 = vpop.f32.mrb[29].mxu0  ;;  %v1752_v57 = vrot.slane %v1743_v34, 3 }
 0xfd3   : > { %v1753_v36 = vrot.slane %v1745_v35, 3  ;;  %v1747_v37 = vpop.f32.mrb[30].mxu0 }
 0xfd4   : > { %v1748_v38 = vpop.f32.mrb[31].mxu0  ;;  %v1756_v59 = vadd.f32 %v1752_v57, %v3075_v7 }
 0xfd5   : > { %v1757_v54 = vadd.f32 %v1753_v36, %v3070_v58 }
 0xfd6   : > { %v1758_v62 = vmul.f32 0.5, %v1756_v59 }
 0xfd7   : > { %2637 = vtanh.f32 %v1757_v54  ;;  %v1759_v45 = vmul.f32 0.5, %v1757_v54 }
 0xfd8   : > { %2639 = vtanh.f32 %v1758_v62 }
 0xfe1   : > { %v2638_v3 = vpop.eup %2637 }
 0xfe2   : > { %1772 = vrot.lane.b32.xlu1 %v2638_v3, %s2675_s27  ;;  %v2640_v63 = vpop.eup %2639 }
 0xfe3   : > { %v1762_v1 = vmul.f32 0.5, %v2640_v63 }
 0xfe5   : > { %v1764_v39 = vadd.f32 0.5, %v1762_v1 }
 0xfe7   : > { %v1770_v42 = vmul.f32 %v1768_v41, %v1764_v39 }
0x1054   : > { %v1773_v4 = vpop.permute.xlu1 %1772 }
0x1055   : > { %v1775_v40 = vmul.f32 %v1773_v4, %v1764_v39 }
0x1057   : > { %1777 = vrot.lane.b32.xlu0 %v1775_v40, %s2675_s27 }
0x10c9   : > { %v1778_v52 = vpop.permute.xlu0 %1777 }
0x10ca   : > { %v1780_v43 = vadd.f32 %v1778_v52, %v1770_v42  ;;  %v1999_v52 = vld [vmem:[%s3200_s1 + $0x540] sm:$0xf] }
0x10cc   : > { %2641 = vtanh.f32 %v1780_v43  ;;  %v1854_v17 = vrot.slane %v1780_v43, 7 }
0x10cd   : > { %2643 = vtanh.f32 %v1759_v45  ;;  %v2011_v45 = vsel %vm642_vm4, %v1999_v52, 0 }
0x10d6   : > { %v2642_v44 = vpop.eup %2641 }
0x10d7   : > { %1783 = vrot.lane.b32.xlu1 %v2642_v44, %s2675_s27  ;;  %v2644_v46 = vpop.eup %2643  ;;  %v2677_v44 = vmov 0.0  }
0x10d8   : > { %v1763_v47 = vmul.f32 0.5, %v2644_v46  ;;  %2464 = vmatprep.subr.bf16.mxu1 %v2677_v44 }
0x10da   : > { %v1765_v48 = vadd.f32 0.5, %v1763_v47 }
0x1149   : > { %v1784_v49 = vpop.permute.xlu1 %1783 }
0x114a   : > { %v1786_v50 = vmul.f32 %v1784_v49, %v1765_v48 }
0x114c   : > { %v1787_v51 = vpack.c.bf16 %v1786_v50, %v1786_v50 }
0x114e   : > { %v1789_v53 = vshrl.u32 %v1787_v51, 16 }
0x1150   : > { %v1791_v55 = vrot.slane %v1789_v53, 2 }
0x1152   : > { %2279 = vmatmul.mubr.msk.bf16.vlgmr.msra.gmra.mrb[32].mxu1 %vm164_vm1, %v1791_v55 }
0x1153   : > { %2465 = vmatpush3.bf16.msra.mxu1 %v2011_v45  ;;  %2466 = vmatprep.mubr.msk.bf16.mxu1 %vm2680_vm5, %v2677_v44 }
0x1154   : > { %2470 = vmatprep.subr.bf16.mxu1 %v2677_v44 }
0x1225   : > { %v1829_v60 = vpop.f32.mrb[32].mxu1 }
0x1226   : > { %v1831_v61 = vpop.f32.mrb[33].mxu1  ;;  %v1838_v9 = vrot.slane %v1829_v60, 2 }
0x1227   : > { %v1839_v0 = vrot.slane %v1831_v61, 2  ;;  %v1833_v2 = vpop.f32.mrb[34].mxu1 }
0x1228   : > { %v1834_v5 = vpop.f32.mrb[35].mxu1  ;;  %v1842_v10 = vadd.f32 %v1838_v9, %v3075_v7 }
0x1229   : > { %v1843_v6 = vadd.f32 %v1839_v0, %v3070_v58 }
0x122a   : > { %v1844_v11 = vmul.f32 0.5, %v1842_v10 }
0x122b   : > { %2645 = vtanh.f32 %v1843_v6  ;;  %v1845_v22 = vmul.f32 0.5, %v1843_v6 }
0x122c   : > { %2647 = vtanh.f32 %v1844_v11 }
0x1235   : > { %v2646_v8 = vpop.eup %2645 }
0x1236   : > { %1858 = vrot.lane.b32.xlu0 %v2646_v8, %s2675_s27  ;;  %v2648_v12 = vpop.eup %2647 }
0x1237   : > { %v1848_v13 = vmul.f32 0.5, %v2648_v12 }
0x1239   : > { %v1850_v14 = vadd.f32 0.5, %v1848_v13 }
0x123b   : > { %v1856_v18 = vmul.f32 %v1854_v17, %v1850_v14 }
0x12a8   : > { %v1859_v15 = vpop.permute.xlu0 %1858 }
0x12a9   : > { %v1861_v16 = vmul.f32 %v1859_v15, %v1850_v14 }
0x12ab   : > { %1863 = vrot.lane.b32.xlu1 %v1861_v16, %s2675_s27 }
0x131d   : > { %v1864_v19 = vpop.permute.xlu1 %1863 }
0x131e   : > { %v1866_v20 = vadd.f32 %v1864_v19, %v1856_v18  ;;  %v2059_v19 = vld [vmem:[%s3200_s1 + $0x550] sm:$0xf] }
0x1320   : > { %2649 = vtanh.f32 %v1866_v20  ;;  %v1938_v1 = vrot.slane %v1866_v20, 7  ;;  %v2070_v20 = vsel %vm642_vm4, %v2059_v19, 0 }
0x1321   : > { %2651 = vtanh.f32 %v1845_v22 }
0x132a   : > { %v2650_v21 = vpop.eup %2649 }
0x132b   : > { %1869 = vrot.lane.b32.xlu0 %v2650_v21, %s2675_s27  ;;  %v2652_v23 = vpop.eup %2651  ;;  %v2000_v21 = vld [vmem:[%s3200_s1 + $0x548] sm:$0x1] }
0x132c   : > { %v1849_v24 = vmul.f32 0.5, %v2652_v23  ;;  %v2001_v22 = vunpack.c.l.bf16 %v2000_v21 }
0x132e   : > { %v1851_v25 = vadd.f32 0.5, %v1849_v24  ;;  %v2005_v23 = vrot.slane %v2001_v22, %v2827_v56 }
0x139d   : > { %v1870_v26 = vpop.permute.xlu0 %1869 }
0x139e   : > { %v1872_v27 = vmul.f32 %v1870_v26, %v1851_v25 }
0x13a0   : > { %v1873_v28 = vpack.c.bf16 %v1872_v27, %v1872_v27 }
0x13a2   : > { %v1875_v29 = vrot.slane %v1873_v28, 3 }
0x13a4   : > { %2280 = vmatmul.mubr.msk.bf16.vlgmr.msra.gmra.mrb[32].mxu0 %vm164_vm1, %v1875_v29 }
0x1477   : > { %v1913_v30 = vpop.f32.mrb[32].mxu0 }
0x1478   : > { %v1915_v31 = vpop.f32.mrb[33].mxu0  ;;  %v1922_v37 = vrot.slane %v1913_v30, 1 }
0x1479   : > { %v1923_v32 = vrot.slane %v1915_v31, 1  ;;  %v1917_v33 = vpop.f32.mrb[34].mxu0 }
0x147a   : > { %v1918_v34 = vpop.f32.mrb[35].mxu0  ;;  %v1926_v38 = vadd.f32 %v1922_v37, %v3075_v7 }
0x147b   : > { %v1927_v35 = vadd.f32 %v1923_v32, %v3070_v58  ;;  %v2060_v34 = vld [vmem:[%s3200_s1 + $0x558] sm:$0x1] }
0x147c   : > { %v1928_v54 = vmul.f32 0.5, %v1926_v38 }
0x147d   : > { %2653 = vtanh.f32 %v1927_v35  ;;  %v1929_v41 = vmul.f32 0.5, %v1927_v35  ;;  %v2061_v35 = vunpack.c.l.bf16 %v2060_v34 }
0x147e   : > { %2655 = vtanh.f32 %v1928_v54 }
0x1487   : > { %v2654_v36 = vpop.eup %2653 }
0x1488   : > { %1942 = vrot.lane.b32.xlu1 %v2654_v36, %s2675_s27  ;;  %v2656_v3 = vpop.eup %2655  ;;  %v2065_v36 = vrot.slane %v2061_v35, %v2827_v56 }
0x1489   : > { %v1932_v57 = vmul.f32 0.5, %v2656_v3 }
0x148b   : > { %v1934_v59 = vadd.f32 0.5, %v1932_v57 }
0x148d   : > { %v1940_v39 = vmul.f32 %v1938_v1, %v1934_v59 }
0x14fa   : > { %v1943_v62 = vpop.permute.xlu1 %1942 }
0x14fb   : > { %v1945_v63 = vmul.f32 %v1943_v62, %v1934_v59 }
0x14fd   : > { %1947 = vrot.lane.b32.xlu0 %v1945_v63, %s2675_s27 }
0x156f   : > { %v1948_v4 = vpop.permute.xlu0 %1947 }
0x1570   : > { %v1950_v58 = vadd.f32 %v1948_v4, %v1940_v39 }
0x1572   : > { %2657 = vtanh.f32 %v1950_v58 }
0x1573   : > { %2659 = vtanh.f32 %v1929_v41 }
0x157c   : > { %v2658_v40 = vpop.eup %2657 }
0x157d   : > { %1953 = vrot.lane.b32.xlu1 %v2658_v40, %s2675_s27  ;;  %v2660_v7 = vpop.eup %2659  ;;  %s2678_s27 = smov 112  }
0x157e   : > { %v1933_v42 = vmul.f32 0.5, %v2660_v7 }
0x1580   : > { %v1935_v43 = vadd.f32 0.5, %v1933_v42 }
0x15ef   : > { %v1954_v46 = vpop.permute.xlu1 %1953 }
0x15f0   : > { %v1956_v47 = vmul.f32 %v1954_v46, %v1935_v43 }
0x15f2   : > { %v1957_v48 = vmax.f32 %v1956_v47, 0.0 }
0x15f4   : > { %v1965_v49 = vrot.slane %v1957_v48, 5  ;;  %v1961_v50 = vrot.slane %v1957_v48, 6  ;;  %v1973_v51 = vrot.slane %v1957_v48, 3  ;;  %v1969_v53 = vrot.slane %v1957_v48, 4 }
0x15f5   : > { %v1981_v55 = vrot.slane %v1957_v48, 1  ;;  %v1977_v60 = vrot.slane %v1957_v48, 2  ;;  %v1959_v61 = vrot.slane %v1957_v48, 7 }
0x15f6   : > { %1966 = vrot.lane.b32.xlu1 %v1965_v49, %s2678_s27  ;;  %1962 = vrot.lane.b32.xlu0 %v1961_v50, %s2679_s26 }
0x15fa   : > { %1974 = vrot.lane.b32.xlu1 %v1973_v51, %s2681_s28  ;;  %1970 = vrot.lane.b32.xlu0 %v1969_v53, %s2682_s29 }
0x15fe   : > { %1982 = vrot.lane.b32.xlu1 %v1981_v55, %s2683_s30  ;;  %1978 = vrot.lane.b32.xlu0 %v1977_v60, %s2684_s3 }
0x1602   : > { %1985 = vrot.lane.b32.xlu0 %v1957_v48, %s2685_s4 }
0x1668   : > { %v1967_v0 = vpop.permute.xlu1 %1966  ;;  %v1963_v2 = vpop.permute.xlu0 %1962 }
0x1669   : > { %v1989_v5 = vsel %vm1988_vm6, %v1959_v61, %v1963_v2 }
0x166a   : > { %v1991_v9 = vsel %vm1990_vm7, %v1989_v5, %v1967_v0 }
0x166c   : > { %v1975_v6 = vpop.permute.xlu1 %1974  ;;  %v1971_v8 = vpop.permute.xlu0 %1970 }
0x166d   : > { %v1993_v10 = vsel %vm1992_vm8, %v1991_v9, %v1971_v8 }
0x166e   : > { %v1994_v12 = vsel %vm642_vm4, %v1993_v10, %v1975_v6 }
0x1670   : > { %v1979_v11 = vpop.permute.xlu0 %1978  ;;  %v1983_v13 = vpop.permute.xlu1 %1982 }
0x1671   : > { %v1995_v14 = vsel %vm633_vm3, %v1994_v12, %v1979_v11 }
0x1672   : > { %v1996_v16 = vsel %vm302_vm2, %v1995_v14, %v1983_v13 }
0x1674   : > { %v1986_v15 = vpop.permute.xlu0 %1985 }
0x1675   : > { %v1997_v17 = vsel %vm149_vm0, %v1996_v16, %v1986_v15 }
0x1676   : > { %v1998_v18 = vpack.c.bf16 %v1997_v17, %v1997_v17 }
0x1678   : > { %2467 = vmatmul.mubr.msk.bf16.vlgmr.msra.gmra.mrb[36].mxu1 %vm2006_vm9, %v1998_v18 }
0x1679   : > { %2472 = vmatprep.mubr.msk.bf16.mxu1 %vm2680_vm5, %v2677_v44  ;;  %2471 = vmatpush3.bf16.msra.mxu1 %v2070_v20 }
0x174b   : > { %v2047_v24 = vpop.f32.mrb[36].mxu1 }
0x174c   : > { %v2048_v25 = vadd.f32 %v2047_v24, %v2005_v23  ;;  %v2468_v26 = vpop.f32.mrb[37].mxu1 }
0x174d   : > { %v2050_v27 = vpop.f32.mrb[38].mxu1 }
0x174e   : > { %v2054_v28 = vmul.f32 1.442695, %v2048_v25  ;;  %v2469_v29 = vpop.f32.mrb[39].mxu1  ;;  %vm2053_vm10 = vcmp.gt.f32.partialorder %v2048_v25, 0.0 }
0x1750   : > { %2661 = vpow2.f32 %v2054_v28 }
0x175a   : > { %v2662_v30 = vpop.eup %2661 }
0x175b   : > { %v2282_v31 = vadd.f32 -1.0, %v2662_v30 }
0x175d   : > { %v2057_v32 = vsel %vm2053_vm10, %v2048_v25, %v2282_v31 }
0x175e   : > { %v2058_v33 = vpack.c.bf16 %v2057_v32, %v2057_v32 }
0x1760   : > { %2473 = vmatmul.mubr.msk.bf16.vlgmr.msra.gmra.mrb[40].mxu1 %vm2006_vm9, %v2058_v33 }
0x1833   : > { %v2106_v37 = vpop.f32.mrb[40].mxu1 }
0x1834   : > { %v2107_v38 = vadd.f32 %v2106_v37, %v2065_v36  ;;  %v2474_v54 = vpop.f32.mrb[41].mxu1 }
0x1835   : > { %v2109_v3 = vpop.f32.mrb[42].mxu1 }
0x1836   : > { %v2475_v57 = vpop.f32.mrb[43].mxu1  ;;  %v2113_v59 = vsel %vm2112_vm11, %v2107_v38, -inf }
0x1837   : > { %2114 = vmax.xlane.f32.xlu1 %v2113_v59 }
0x18c4   : > { %v2115_v62 = vpop.xlane.xlu1 %2114 }
0x18c5   : > { %v2116_v63 = vsub.f32 %v2107_v38, %v2115_v62 }
0x18c7   : > { %v2117_v1 = vmul.f32 1.442695, %v2116_v63 }
0x18c9   : > { %2663 = vpow2.f32 %v2117_v1 }
0x18d3   : > { %v2664_v39 = vpop.eup %2663 }
0x18d4   : > { %v2119_v4 = vsel %vm2112_vm11, %v2664_v39, 0.0 }
0x18d5   : > { %2120 = vadd.xlane.f32.xlu0 %v2119_v4 }
0x1962   : > { %v2121_v58 = vpop.xlane.xlu0 %2120 }
0x1963   : > { %2665 = vrcp.f32 %v2121_v58 }
0x196d   : > { %v2666_v56 = vpop.eup %2665 }
0x196e   : > { %v2123_v40 = vmul.f32 %v2666_v56, %v2664_v39 }
0x1970   : > { %2124 = vst.msk [vmem:[%s141_s16] sm:$0xff] %vm2112_vm11, %v2123_v40 }
0x1971 PF: > { %s12_s9 = sadd.s32 1, %s2673_s9  }
0x1972   : > { %p9_p4 = scmp.ge.s32.totalorder %s12_s9, 4  }
0x1974   :  { %11 = sbr.rel (!%p9_p4) target bundleno = 1 (0x1), region = 59 }

</bundles_post_ra>
